<compile_context>
chip_gen: v7x
topology: tpu7x:2x2x1
jax: 0.10.0
libtpu: 0.0.40
codegen_flags: <defaults>
</compile_context>

<pallas_src>
import functools
import math

import jax
import jax.numpy as jnp
from jax.experimental import pallas as pl
from jax.experimental.pallas import tpu as pltpu  # noqa: F401  (TPU backend assumed)

# ----------------------------- config (small synthetic BERT) -----------------------------
VOCAB = 128
MAX_POS = 16
TYPE_VOCAB = 2          # kernel assumes exactly 2 token types (standard BERT)
HIDDEN = 32
NUM_HEADS = 2
HEAD_DIM = HIDDEN // NUM_HEADS
INTERMEDIATE = 64
NUM_LAYERS = 2
NUM_LABELS = 4
BATCH = 2
SEQ = 8
LN_EPS = 1e-12
OUT_PAD = 128           # lane-dense padded width for the vector slab and the output slab

# vector-slab row layout
_VEC_EMB_G, _VEC_EMB_B, _VEC_OUT_BIAS, _VEC_LAYER0, _VEC_PER_LAYER = 0, 1, 2, 3, 8
# per-layer offsets inside the slab
_BQKV, _BO, _LN1G, _LN1B, _BI, _BO2, _LN2G, _LN2B = range(8)


# ----------------------------- fused Pallas kernel -----------------------------
def _layernorm(x, g, b, eps=LN_EPS):
    mu = jnp.mean(x, axis=-1, keepdims=True)
    var = jnp.mean(jnp.square(x - mu), axis=-1, keepdims=True)
    return (x - mu) * jax.lax.rsqrt(var + eps) * g + b


def _bert_fused_kernel(
    idt_ref,       # [M, 2]  int32 : (input_id, token_type_id) per token
    bias_ref,      # [B, 1, S] f32 : additive attention bias (0 valid, -1e9 pad)
    tabs_ref,      # [VOCAB + MAX_POS + TYPE_VOCAB, H] f32 embedding tables
    vecs_ref,      # [3 + 8*L, OUT_PAD] f32 : all bias / LayerNorm vectors (+ out bias row)
    wqkv_ref,      # [L, H, 3H] bf16
    wo_ref,        # [L, H, H]  bf16
    wi_ref,        # [L, H, I]  bf16
    wo2_ref,       # [L, I, H]  bf16
    wout_ref,      # [H, OUT_PAD] f32 :  [ I_H | W_classifier | 0 ]
    out_ref,       # [B, OUT_PAD] f32 :  [ pooled | logits | 0 ]
    *, batch, seq, num_layers, num_heads, head_dim,
):
    hidden = num_heads * head_dim
    inter = wi_ref.shape[-1]
    m = batch * seq
    scale = 1.0 / math.sqrt(head_dim)

    def vrow(r, width=OUT_PAD):                 # (1, width) f32, static slice of the slab
        return vecs_ref[r:r + 1, 0:width]

    # ---------------- embeddings (gather done in-kernel, review item) ----------------
    ids = idt_ref[:, 0:1]                       # [M, 1] int32
    tts = idt_ref[:, 1:2]                       # [M, 1] int32
    word_oh = (ids == jax.lax.broadcasted_iota(jnp.int32, (m, VOCAB), 1)).astype(jnp.float32)
    emb = jnp.dot(word_oh, tabs_ref[0:VOCAB, :], preferred_element_type=jnp.float32)  # [M, H]
    type0 = tabs_ref[VOCAB + MAX_POS:VOCAB + MAX_POS + 1, :]        # (1, H)
    type1 = tabs_ref[VOCAB + MAX_POS + 1:VOCAB + MAX_POS + 2, :]    # (1, H)
    emb = emb + jnp.where(tts == 0, type0, type1)                   # TYPE_VOCAB == 2
    pos = tabs_ref[VOCAB:VOCAB + seq, :]                            # (S, H)
    emb = (emb.reshape(batch, seq, hidden) + pos[None, :, :]).reshape(m, hidden)

    x = _layernorm(emb, vrow(_VEC_EMB_G, hidden), vrow(_VEC_EMB_B, hidden))   # [M, H] f32
    bias = bias_ref[...]                                                      # [B, 1, S]

    # ---------------- transformer layers (2 layers: static unroll is fine) ----------------
    for li in range(num_layers):
        r = _VEC_LAYER0 + _VEC_PER_LAYER * li
        w_qkv = wqkv_ref[li]          # (H, 3H) bf16, resident in VMEM
        w_o = wo_ref[li]              # (H, H)  bf16
        w_i = wi_ref[li]              # (H, I)  bf16
        w_o2 = wo2_ref[li]            # (I, H)  bf16

        # fused QKV projection: bf16 x bf16 on the MXU, f32 accumulation
        qkv = jnp.dot(x.astype(jnp.bfloat16), w_qkv,
                      preferred_element_type=jnp.float32) + vrow(r + _BQKV, 3 * hidden)

        # Per-head attention with single-batch-dim einsums (guaranteed Mosaic lowering).
        # The output projection is folded into the head loop, which removes the lane-wise
        # concat of per-head contexts (review item 1, partially).
        attn = None
        for h in range(num_heads):
            lo = h * head_dim
            q = qkv[:, lo:lo + head_dim].reshape(batch, seq, head_dim)
            k = qkv[:, hidden + lo:hidden + lo + head_dim].reshape(batch, seq, head_dim)
            v = qkv[:, 2 * hidden + lo:2 * hidden + lo + head_dim].reshape(batch, seq, head_dim)
            s = jnp.einsum("bqd,bkd->bqk", q, k,
                           preferred_element_type=jnp.float32) * scale + bias
            s = s - jnp.max(s, axis=-1, keepdims=True)
            p = jnp.exp(s)
            # EUP vrcp: effectively free in this VALU/XLU-bound region
            p = p * pl.reciprocal(jnp.sum(p, axis=-1, keepdims=True), approx=True)
            ctx = jnp.einsum("bqk,bkd->bqd", p, v,
                             preferred_element_type=jnp.float32).reshape(m, head_dim)
            proj = jnp.dot(ctx.astype(jnp.bfloat16), w_o[lo:lo + head_dim, :],
                           preferred_element_type=jnp.float32)
            attn = proj if attn is None else attn + proj
        attn = attn + vrow(r + _BO, hidden)
        x = _layernorm(attn + x, vrow(r + _LN1G, hidden), vrow(r + _LN1B, hidden))

        ffn = jnp.dot(x.astype(jnp.bfloat16), w_i,
                      preferred_element_type=jnp.float32) + vrow(r + _BI, inter)
        # TODO(synk): HF BERT default is exact-erf GELU; tanh approximation used here because
        # an erf lowering inside Mosaic is not guaranteed on all jax versions.
        ffn = jax.nn.gelu(ffn, approximate=True)
        ffn = jnp.dot(ffn.astype(jnp.bfloat16), w_o2,
                      preferred_element_type=jnp.float32) + vrow(r + _BO2, hidden)
        x = _layernorm(ffn + x, vrow(r + _LN2G, hidden), vrow(r + _LN2B, hidden))

    # ---------------- pooling + classifier epilogue (lane-dense output) ----------------
    h3 = x.reshape(batch, seq, hidden)
    # mean over tokens[1:] without the odd 7-row sublane slice; dropout(0.1) == id in eval
    pooled = (jnp.sum(h3, axis=1) - h3[:, 0, :]) * (1.0 / (seq - 1))          # [B, H] f32
    # [pooled | logits | 0] in one f32 matmul against [I | W_c | 0]; single unmasked store
    out_ref[...] = (jnp.dot(pooled, wout_ref[...], preferred_element_type=jnp.float32)
                    + vrow(_VEC_OUT_BIAS)).astype(out_ref.dtype)


def _full_block(shape):
    nd = len(shape)
    return pl.BlockSpec(shape, lambda _nd=nd: (0,) * _nd)


def _bert_fused_call(packed, idt, attn_bias, batch, seq):
    inputs = (idt, attn_bias, packed["tabs"], packed["vecs"],
              packed["wqkv"], packed["wo"], packed["wi"], packed["wo2"], packed["wout"])
    kernel = functools.partial(
        _bert_fused_kernel, batch=batch, seq=seq,
        num_layers=NUM_LAYERS, num_heads=NUM_HEADS, head_dim=HEAD_DIM)
    # No grid: everything (< 1 MiB) stays resident in VMEM on v5e/v6e/v7x; no vmem_limit or
    # tiling needed.  For realistic batch sizes, add a grid axis over batch marked "parallel"
    # so v7x's second TensorCore is used.
    return pl.pallas_call(
        kernel,
        out_shape=jax.ShapeDtypeStruct((batch, OUT_PAD), jnp.float32),
        in_specs=[_full_block(a.shape) for a in inputs],
        out_specs=_full_block((batch, OUT_PAD)),
    )(*inputs)


# ----------------------------- parameter init (deterministic, synthetic) -----------------------------
def init_params(key):
    f32 = jnp.float32

    def normal(k, shape, scale=0.02):
        return (scale * jax.random.normal(k, shape)).astype(f32)

    keys = jax.random.split(key, 8 + NUM_LAYERS)
    params = {
        "word_emb": normal(keys[0], (VOCAB, HIDDEN)),
        "pos_emb": normal(keys[1], (MAX_POS, HIDDEN)),
        "type_emb": normal(keys[2], (TYPE_VOCAB, HIDDEN)),
        "emb_ln_g": 1.0 + normal(keys[3], (HIDDEN,)),
        "emb_ln_b": normal(keys[4], (HIDDEN,)),
        "wc": normal(keys[5], (HIDDEN, NUM_LABELS)),      # classifier kept f32 (512 B)
        "bc": normal(keys[6], (NUM_LABELS,)),
    }
    wqkv, bqkv, wo, bo, ln1g, ln1b, wi, bi, wo2, bo2, ln2g, ln2b = ([] for _ in range(12))
    for li in range(NUM_LAYERS):
        lk = jax.random.split(keys[8 + li], 14)
        wq, wk, wv = (normal(lk[j], (HIDDEN, HIDDEN)) for j in range(3))
        # fused QKV weight; big weight stacks cast to bf16 on the host (halves DMA bytes)
        wqkv.append(jnp.concatenate([wq, wk, wv], axis=1).astype(jnp.bfloat16))
        bqkv.append(normal(lk[3], (3 * HIDDEN,)))
        wo.append(normal(lk[4], (HIDDEN, HIDDEN)).astype(jnp.bfloat16))
        bo.append(normal(lk[5], (HIDDEN,)))
        ln1g.append(1.0 + normal(lk[6], (HIDDEN,)))
        ln1b.append(normal(lk[7], (HIDDEN,)))
        wi.append(normal(lk[8], (HIDDEN, INTERMEDIATE)).astype(jnp.bfloat16))
        bi.append(normal(lk[9], (INTERMEDIATE,)))
        wo2.append(normal(lk[10], (INTERMEDIATE, HIDDEN)).astype(jnp.bfloat16))
        bo2.append(normal(lk[11], (HIDDEN,)))
        ln2g.append(1.0 + normal(lk[12], (HIDDEN,)))
        ln2b.append(normal(lk[13], (HIDDEN,)))

    stack = lambda xs: jnp.stack(xs, axis=0)
    params.update({
        "wqkv": stack(wqkv), "bqkv": stack(bqkv),
        "wo": stack(wo), "bo": stack(bo),
        "ln1_g": stack(ln1g), "ln1_b": stack(ln1b),
        "wi": stack(wi), "bi": stack(bi),
        "wo2": stack(wo2), "bo2": stack(bo2),
        "ln2_g": stack(ln2g), "ln2_b": stack(ln2b),
    })
    return params


def pack_params(params):
    """Pack the many small operands into a few contiguous slabs (review item)."""
    f32 = jnp.float32
    n_rows = _VEC_LAYER0 + _VEC_PER_LAYER * NUM_LAYERS
    vecs = jnp.zeros((n_rows, OUT_PAD), f32)
    vecs = vecs.at[_VEC_EMB_G, :HIDDEN].set(params["emb_ln_g"])
    vecs = vecs.at[_VEC_EMB_B, :HIDDEN].set(params["emb_ln_b"])
    vecs = vecs.at[_VEC_OUT_BIAS, HIDDEN:HIDDEN + NUM_LABELS].set(params["bc"])
    for li in range(NUM_LAYERS):
        r = _VEC_LAYER0 + _VEC_PER_LAYER * li
        vecs = vecs.at[r + _BQKV, :3 * HIDDEN].set(params["bqkv"][li])
        vecs = vecs.at[r + _BO, :HIDDEN].set(params["bo"][li])
        vecs = vecs.at[r + _LN1G, :HIDDEN].set(params["ln1_g"][li])
        vecs = vecs.at[r + _LN1B, :HIDDEN].set(params["ln1_b"][li])
        vecs = vecs.at[r + _BI, :INTERMEDIATE].set(params["bi"][li])
        vecs = vecs.at[r + _BO2, :HIDDEN].set(params["bo2"][li])
        vecs = vecs.at[r + _LN2G, :HIDDEN].set(params["ln2_g"][li])
        vecs = vecs.at[r + _LN2B, :HIDDEN].set(params["ln2_b"][li])

    tabs = jnp.concatenate(
        [params["word_emb"], params["pos_emb"], params["type_emb"]], axis=0)     # [146, H]
    wout = jnp.concatenate(
        [jnp.eye(HIDDEN, dtype=f32), params["wc"],
         jnp.zeros((HIDDEN, OUT_PAD - HIDDEN - NUM_LABELS), f32)], axis=1)        # [H, 128]
    return {"vecs": vecs, "tabs": tabs, "wout": wout,
            "wqkv": params["wqkv"], "wo": params["wo"],
            "wi": params["wi"], "wo2": params["wo2"]}


# ----------------------------- forward wrapper -----------------------------
def bert_for_model_forward(packed, input_ids, token_type_ids, attention_mask=None):
    B, S = input_ids.shape
    if attention_mask is None:
        attention_mask = jnp.ones((B, S), jnp.float32)
    idt = jnp.stack([input_ids.reshape(-1), token_type_ids.reshape(-1)], axis=-1).astype(jnp.int32)
    attn_bias = ((attention_mask.astype(jnp.float32) - 1.0) * 1e9)[:, None, :]     # [B, 1, S]
    out = _bert_fused_call(packed, idt, attn_bias, B, S)                           # [B, 128]
    cls_embedding = out[:, :HIDDEN]
    logits = out[:, HIDDEN:HIDDEN + NUM_LABELS]
    return cls_embedding, logits


# ----------------------------- pure-JAX reference (same math / same bf16 policy) -----------------
def _reference_forward(params, input_ids, token_type_ids, attention_mask):
    B, S = input_ids.shape
    f32 = jnp.float32

    def bdot(a, w):  # mirror the kernel's bf16 x bf16 -> f32 matmul policy
        return jnp.dot(a.astype(jnp.bfloat16), w, preferred_element_type=f32)

    def ln(x, g, b):
        mu = jnp.mean(x, -1, keepdims=True)
        var = jnp.mean((x - mu) ** 2, -1, keepdims=True)
        return (x - mu) / jnp.sqrt(var + LN_EPS) * g + b

    emb = (params["word_emb"][input_ids]
           + params["pos_emb"][jnp.arange(S)][None, :, :]
           + params["type_emb"][token_type_ids])
    x = ln(emb, params["emb_ln_g"], params["emb_ln_b"])
    bias = ((attention_mask.astype(f32) - 1.0) * 1e9)[:, None, None, :]

    for li in range(NUM_LAYERS):
        qkv = bdot(x, params["wqkv"][li]) + params["bqkv"][li]
        q, k, v = jnp.split(qkv, 3, axis=-1)

        def heads(t):
            return t.reshape(B, S, NUM_HEADS, HEAD_DIM).transpose(0, 2, 1, 3)

        qh, kh, vh = heads(q), heads(k), heads(v)
        s = jnp.einsum("bhqd,bhkd->bhqk", qh, kh) / math.sqrt(HEAD_DIM) + bias
        p = jax.nn.softmax(s, axis=-1)
        ctx = jnp.einsum("bhqk,bhkd->bhqd", p, vh).transpose(0, 2, 1, 3).reshape(B, S, HIDDEN)
        attn = bdot(ctx, params["wo"][li]) + params["bo"][li]
        x = ln(attn + x, params["ln1_g"][li], params["ln1_b"][li])
        ffn = jax.nn.gelu(bdot(x, params["wi"][li]) + params["bi"][li], approximate=True)
        ffn = bdot(ffn, params["wo2"][li]) + params["bo2"][li]
        x = ln(ffn + x, params["ln2_g"][li], params["ln2_b"][li])

    pooled = jnp.mean(x[:, 1:, :], axis=1)
    logits = pooled @ params["wc"] + params["bc"]
    return pooled, logits


# ----------------------------- main -----------------------------
if __name__ == "__main__":
    key = jax.random.PRNGKey(0)
    pkey, dkey = jax.random.split(key)
    params = init_params(pkey)
    packed = pack_params(params)

    input_ids = jax.random.randint(dkey, (BATCH, SEQ), 0, VOCAB, dtype=jnp.int32)
    token_type_ids = jnp.zeros((BATCH, SEQ), jnp.int32).at[:, SEQ // 2:].set(1)
    attention_mask = jnp.ones((BATCH, SEQ), jnp.float32).at[1, SEQ - 2:].set(0.0)

    cls_embedding, logits = bert_for_model_forward(
        packed, input_ids, token_type_ids, attention_mask)
    jax.block_until_ready((cls_embedding, logits))

    assert cls_embedding.shape == (BATCH, HIDDEN)
    assert logits.shape == (BATCH, NUM_LABELS)

    ref_cls, ref_logits = _reference_forward(params, input_ids, token_type_ids, attention_mask)
    # 2e-3 tolerance: accounts for the EUP approx reciprocal in the softmax (~2^-12 rel) plus
    # MXU-vs-XLA accumulation-order differences; bf16 weight rounding is identical on both sides.
    assert jnp.allclose(cls_embedding, ref_cls, atol=2e-3, rtol=2e-3), "cls embedding mismatch"
    assert jnp.allclose(logits, ref_logits, atol=2e-3, rtol=2e-3), "logits mismatch"

    print("KERNEL_OK")
</pallas_src>

<mosaic_0001>
module attributes {stable_mosaic.version = 11 : i64} {
  func.func @_bert_fused_kernel(%arg0: memref<16x2xi32, #tpu.memory_space<vmem>>, %arg1: memref<2x1x8xf32, #tpu.memory_space<vmem>>, %arg2: memref<146x32xf32, #tpu.memory_space<vmem>>, %arg3: memref<19x128xf32, #tpu.memory_space<vmem>>, %arg4: memref<2x32x96xbf16, #tpu.memory_space<vmem>>, %arg5: memref<2x32x32xbf16, #tpu.memory_space<vmem>>, %arg6: memref<2x32x64xbf16, #tpu.memory_space<vmem>>, %arg7: memref<2x64x32xbf16, #tpu.memory_space<vmem>>, %arg8: memref<32x128xf32, #tpu.memory_space<vmem>>, %arg9: memref<2x128xf32, #tpu.memory_space<vmem>>) attributes {dimension_semantics = [], scalar_prefetch = 0 : i64, scratch_operands = 0 : i64, tpu.core_type = #tpu.core_type<tc>} {
    %c0 = arith.constant 0 : index
    %c0_0 = arith.constant 0 : index
    %0 = vector.load %arg0[%c0, %c0_0] : memref<16x2xi32, #tpu.memory_space<vmem>>, vector<16x1xi32>
    %c0_1 = arith.constant 0 : index
    %c1 = arith.constant 1 : index
    %1 = vector.load %arg0[%c0_1, %c1] : memref<16x2xi32, #tpu.memory_space<vmem>>, vector<16x1xi32>
    %2 = tpu.iota {dimensions = array<i32: 1>} : vector<16x128xi32>
    %3 = vector.broadcast %0 : vector<16x1xi32> to vector<16x128xi32>
    %4 = arith.cmpi eq, %3, %2 : vector<16x128xi32>
    %5 = arith.extui %4 : vector<16x128xi1> to vector<16x128xi32>
    %6 = arith.sitofp %5 : vector<16x128xi32> to vector<16x128xf32>
    %c0_2 = arith.constant 0 : index
    %c0_3 = arith.constant 0 : index
    %7 = vector.load %arg2[%c0_2, %c0_3] : memref<146x32xf32, #tpu.memory_space<vmem>>, vector<128x32xf32>
    %cst = arith.constant dense<0.000000e+00> : vector<16x32xf32>
    %8 = tpu.matmul %6, %7, %cst {dimension_numbers = #tpu.dot_dimension_numbers<[1], [0], [0], [1], [0, 0, 1, 1], [], []>} : vector<16x128xf32>, vector<128x32xf32>, vector<16x32xf32> -> vector<16x32xf32>
    %c144 = arith.constant 144 : index
    %c0_4 = arith.constant 0 : index
    %9 = vector.load %arg2[%c144, %c0_4] : memref<146x32xf32, #tpu.memory_space<vmem>>, vector<1x32xf32>
    %c145 = arith.constant 145 : index
    %c0_5 = arith.constant 0 : index
    %10 = vector.load %arg2[%c145, %c0_5] : memref<146x32xf32, #tpu.memory_space<vmem>>, vector<1x32xf32>
    %c0_i32 = arith.constant 0 : i32
    %11 = vector.broadcast %c0_i32 : i32 to vector<16x1xi32>
    %12 = arith.cmpi eq, %1, %11 : vector<16x1xi32>
    %13 = vector.shape_cast %12 : vector<16x1xi1> to vector<16x1xi1>
    %14 = vector.broadcast %13 : vector<16x1xi1> to vector<16x32xi1>
    %15 = vector.shape_cast %9 : vector<1x32xf32> to vector<1x32xf32>
    %16 = vector.broadcast %15 : vector<1x32xf32> to vector<16x32xf32>
    %17 = vector.shape_cast %10 : vector<1x32xf32> to vector<1x32xf32>
    %18 = vector.broadcast %17 : vector<1x32xf32> to vector<16x32xf32>
    %19 = arith.select %14, %16, %18 : vector<16x32xi1>, vector<16x32xf32>
    %20 = arith.addf %8, %19 : vector<16x32xf32>
    %c128 = arith.constant 128 : index
    %c0_6 = arith.constant 0 : index
    %21 = vector.load %arg2[%c128, %c0_6] : memref<146x32xf32, #tpu.memory_space<vmem>>, vector<8x32xf32>
    %22 = vector.shape_cast %20 : vector<16x32xf32> to vector<2x8x32xf32>
    %23 = vector.shape_cast %21 : vector<8x32xf32> to vector<1x8x32xf32>
    %24 = vector.broadcast %23 : vector<1x8x32xf32> to vector<2x8x32xf32>
    %25 = arith.addf %22, %24 : vector<2x8x32xf32>
    %26 = vector.shape_cast %25 : vector<2x8x32xf32> to vector<16x32xf32>
    %c0_7 = arith.constant 0 : index
    %c0_8 = arith.constant 0 : index
    %27 = vector.load %arg3[%c0_7, %c0_8] : memref<19x128xf32, #tpu.memory_space<vmem>>, vector<1x32xf32>
    %c1_9 = arith.constant 1 : index
    %c0_10 = arith.constant 0 : index
    %28 = vector.load %arg3[%c1_9, %c0_10] : memref<19x128xf32, #tpu.memory_space<vmem>>, vector<1x32xf32>
    %cst_11 = arith.constant dense<0.000000e+00> : vector<16xf32>
    %29 = vector.multi_reduction <add>, %26, %cst_11 [1] : vector<16x32xf32> to vector<16xf32>
    %30 = vector.shape_cast %29 : vector<16xf32> to vector<16x1xf32>
    %cst_12 = arith.constant 3.200000e+01 : f32
    %31 = vector.broadcast %cst_12 : f32 to vector<16x1xf32>
    %32 = arith.divf %30, %31 : vector<16x1xf32>
    %33 = vector.broadcast %32 : vector<16x1xf32> to vector<16x32xf32>
    %34 = arith.subf %26, %33 : vector<16x32xf32>
    %35 = arith.mulf %34, %34 : vector<16x32xf32>
    %cst_13 = arith.constant dense<0.000000e+00> : vector<16xf32>
    %36 = vector.multi_reduction <add>, %35, %cst_13 [1] : vector<16x32xf32> to vector<16xf32>
    %37 = vector.shape_cast %36 : vector<16xf32> to vector<16x1xf32>
    %cst_14 = arith.constant 3.200000e+01 : f32
    %38 = vector.broadcast %cst_14 : f32 to vector<16x1xf32>
    %39 = arith.divf %37, %38 : vector<16x1xf32>
    %40 = vector.broadcast %32 : vector<16x1xf32> to vector<16x32xf32>
    %41 = arith.subf %26, %40 : vector<16x32xf32>
    %cst_15 = arith.constant 9.99999996E-13 : f32
    %42 = vector.broadcast %cst_15 : f32 to vector<16x1xf32>
    %43 = arith.addf %39, %42 : vector<16x1xf32>
    %44 = math.rsqrt %43 : vector<16x1xf32>
    %45 = vector.broadcast %44 : vector<16x1xf32> to vector<16x32xf32>
    %46 = arith.mulf %41, %45 : vector<16x32xf32>
    %47 = vector.broadcast %27 : vector<1x32xf32> to vector<16x32xf32>
    %48 = arith.mulf %46, %47 : vector<16x32xf32>
    %49 = vector.broadcast %28 : vector<1x32xf32> to vector<16x32xf32>
    %50 = arith.addf %48, %49 : vector<16x32xf32>
    %c0_16 = arith.constant 0 : index
    %c0_17 = arith.constant 0 : index
    %c0_18 = arith.constant 0 : index
    %51 = vector.load %arg1[%c0_16, %c0_17, %c0_18] : memref<2x1x8xf32, #tpu.memory_space<vmem>>, vector<2x1x8xf32>
    %c0_19 = arith.constant 0 : index
    %c0_20 = arith.constant 0 : index
    %c0_21 = arith.constant 0 : index
    %52 = vector.load %arg4[%c0_19, %c0_20, %c0_21] : memref<2x32x96xbf16, #tpu.memory_space<vmem>>, vector<1x32x96xbf16>
    %53 = vector.shape_cast %52 : vector<1x32x96xbf16> to vector<32x96xbf16>
    %c0_22 = arith.constant 0 : index
    %c0_23 = arith.constant 0 : index
    %c0_24 = arith.constant 0 : index
    %54 = vector.load %arg5[%c0_22, %c0_23, %c0_24] : memref<2x32x32xbf16, #tpu.memory_space<vmem>>, vector<1x32x32xbf16>
    %55 = vector.shape_cast %54 : vector<1x32x32xbf16> to vector<32x32xbf16>
    %c0_25 = arith.constant 0 : index
    %c0_26 = arith.constant 0 : index
    %c0_27 = arith.constant 0 : index
    %56 = vector.load %arg6[%c0_25, %c0_26, %c0_27] : memref<2x32x64xbf16, #tpu.memory_space<vmem>>, vector<1x32x64xbf16>
    %57 = vector.shape_cast %56 : vector<1x32x64xbf16> to vector<32x64xbf16>
    %c0_28 = arith.constant 0 : index
    %c0_29 = arith.constant 0 : index
    %c0_30 = arith.constant 0 : index
    %58 = vector.load %arg7[%c0_28, %c0_29, %c0_30] : memref<2x64x32xbf16, #tpu.memory_space<vmem>>, vector<1x64x32xbf16>
    %59 = vector.shape_cast %58 : vector<1x64x32xbf16> to vector<64x32xbf16>
    %60 = arith.truncf %50 : vector<16x32xf32> to vector<16x32xbf16>
    %cst_31 = arith.constant dense<0.000000e+00> : vector<16x96xf32>
    %61 = tpu.matmul %60, %53, %cst_31 {dimension_numbers = #tpu.dot_dimension_numbers<[1], [0], [0], [1], [0, 0, 1, 1], [], []>} : vector<16x32xbf16>, vector<32x96xbf16>, vector<16x96xf32> -> vector<16x96xf32>
    %c3 = arith.constant 3 : index
    %c0_32 = arith.constant 0 : index
    %62 = vector.load %arg3[%c3, %c0_32] : memref<19x128xf32, #tpu.memory_space<vmem>>, vector<1x96xf32>
    %63 = vector.broadcast %62 : vector<1x96xf32> to vector<16x96xf32>
    %64 = arith.addf %61, %63 : vector<16x96xf32>
    %65 = vector.extract_strided_slice %64 {offsets = [0, 0], sizes = [16, 16], strides = [1, 1]} : vector<16x96xf32> to vector<16x16xf32>
    %66 = vector.shape_cast %65 : vector<16x16xf32> to vector<2x8x16xf32>
    %67 = vector.extract_strided_slice %64 {offsets = [0, 32], sizes = [16, 16], strides = [1, 1]} : vector<16x96xf32> to vector<16x16xf32>
    %68 = vector.shape_cast %67 : vector<16x16xf32> to vector<2x8x16xf32>
    %69 = vector.extract_strided_slice %64 {offsets = [0, 64], sizes = [16, 16], strides = [1, 1]} : vector<16x96xf32> to vector<16x16xf32>
    %70 = vector.shape_cast %69 : vector<16x16xf32> to vector<2x8x16xf32>
    "tpu.trace_start"() <{level = 10 : i32, message = "bqd,bkd->bqk"}> : () -> ()
    %cst_33 = arith.constant dense<0.000000e+00> : vector<2x8x8xf32>
    %71 = tpu.matmul %66, %68, %cst_33 {dimension_numbers = #tpu.dot_dimension_numbers<[2], [2], [1], [1], [0, 0, 0, 1, 1, 1], [0], [0]>} : vector<2x8x16xf32>, vector<2x8x16xf32>, vector<2x8x8xf32> -> vector<2x8x8xf32>
    "tpu.trace_stop"() : () -> ()
    %cst_34 = arith.constant 2.500000e-01 : f32
    %72 = vector.broadcast %cst_34 : f32 to vector<2x8x8xf32>
    %73 = arith.mulf %71, %72 : vector<2x8x8xf32>
    %74 = vector.broadcast %51 : vector<2x1x8xf32> to vector<2x8x8xf32>
    %75 = arith.addf %73, %74 : vector<2x8x8xf32>
    %cst_35 = arith.constant dense<0xFF800000> : vector<2x8xf32>
    %76 = vector.multi_reduction <maximumf>, %75, %cst_35 [2] : vector<2x8x8xf32> to vector<2x8xf32>
    %77 = vector.shape_cast %76 : vector<2x8xf32> to vector<2x8x1xf32>
    %78 = vector.broadcast %77 : vector<2x8x1xf32> to vector<2x8x8xf32>
    %79 = arith.subf %75, %78 : vector<2x8x8xf32>
    %80 = math.exp %79 : vector<2x8x8xf32>
    %cst_36 = arith.constant dense<0.000000e+00> : vector<2x8xf32>
    %81 = vector.multi_reduction <add>, %80, %cst_36 [2] : vector<2x8x8xf32> to vector<2x8xf32>
    %82 = vector.shape_cast %81 : vector<2x8xf32> to vector<2x8x1xf32>
    %83 = tpu.reciprocal %82 {approx = true} : vector<2x8x1xf32> -> vector<2x8x1xf32>
    %84 = vector.broadcast %83 : vector<2x8x1xf32> to vector<2x8x8xf32>
    %85 = arith.mulf %80, %84 : vector<2x8x8xf32>
    "tpu.trace_start"() <{level = 10 : i32, message = "bqk,bkd->bqd"}> : () -> ()
    %cst_37 = arith.constant dense<0.000000e+00> : vector<2x8x16xf32>
    %86 = tpu.matmul %85, %70, %cst_37 {dimension_numbers = #tpu.dot_dimension_numbers<[2], [1], [1], [2], [0, 0, 0, 1, 1, 2], [0], [0]>} : vector<2x8x8xf32>, vector<2x8x16xf32>, vector<2x8x16xf32> -> vector<2x8x16xf32>
    "tpu.trace_stop"() : () -> ()
    %87 = vector.shape_cast %86 : vector<2x8x16xf32> to vector<16x16xf32>
    %88 = arith.truncf %87 : vector<16x16xf32> to vector<16x16xbf16>
    %89 = vector.extract_strided_slice %55 {offsets = [0, 0], sizes = [16, 32], strides = [1, 1]} : vector<32x32xbf16> to vector<16x32xbf16>
    %cst_38 = arith.constant dense<0.000000e+00> : vector<16x32xf32>
    %90 = tpu.matmul %88, %89, %cst_38 {dimension_numbers = #tpu.dot_dimension_numbers<[1], [0], [0], [1], [0, 0, 1, 1], [], []>} : vector<16x16xbf16>, vector<16x32xbf16>, vector<16x32xf32> -> vector<16x32xf32>
    %91 = vector.extract_strided_slice %64 {offsets = [0, 16], sizes = [16, 16], strides = [1, 1]} : vector<16x96xf32> to vector<16x16xf32>
    %92 = vector.shape_cast %91 : vector<16x16xf32> to vector<2x8x16xf32>
    %93 = vector.extract_strided_slice %64 {offsets = [0, 48], sizes = [16, 16], strides = [1, 1]} : vector<16x96xf32> to vector<16x16xf32>
    %94 = vector.shape_cast %93 : vector<16x16xf32> to vector<2x8x16xf32>
    %95 = vector.extract_strided_slice %64 {offsets = [0, 80], sizes = [16, 16], strides = [1, 1]} : vector<16x96xf32> to vector<16x16xf32>
    %96 = vector.shape_cast %95 : vector<16x16xf32> to vector<2x8x16xf32>
    "tpu.trace_start"() <{level = 10 : i32, message = "bqd,bkd->bqk"}> : () -> ()
    %cst_39 = arith.constant dense<0.000000e+00> : vector<2x8x8xf32>
    %97 = tpu.matmul %92, %94, %cst_39 {dimension_numbers = #tpu.dot_dimension_numbers<[2], [2], [1], [1], [0, 0, 0, 1, 1, 1], [0], [0]>} : vector<2x8x16xf32>, vector<2x8x16xf32>, vector<2x8x8xf32> -> vector<2x8x8xf32>
    "tpu.trace_stop"() : () -> ()
    %cst_40 = arith.constant 2.500000e-01 : f32
    %98 = vector.broadcast %cst_40 : f32 to vector<2x8x8xf32>
    %99 = arith.mulf %97, %98 : vector<2x8x8xf32>
    %100 = vector.broadcast %51 : vector<2x1x8xf32> to vector<2x8x8xf32>
    %101 = arith.addf %99, %100 : vector<2x8x8xf32>
    %cst_41 = arith.constant dense<0xFF800000> : vector<2x8xf32>
    %102 = vector.multi_reduction <maximumf>, %101, %cst_41 [2] : vector<2x8x8xf32> to vector<2x8xf32>
    %103 = vector.shape_cast %102 : vector<2x8xf32> to vector<2x8x1xf32>
    %104 = vector.broadcast %103 : vector<2x8x1xf32> to vector<2x8x8xf32>
    %105 = arith.subf %101, %104 : vector<2x8x8xf32>
    %106 = math.exp %105 : vector<2x8x8xf32>
    %cst_42 = arith.constant dense<0.000000e+00> : vector<2x8xf32>
    %107 = vector.multi_reduction <add>, %106, %cst_42 [2] : vector<2x8x8xf32> to vector<2x8xf32>
    %108 = vector.shape_cast %107 : vector<2x8xf32> to vector<2x8x1xf32>
    %109 = tpu.reciprocal %108 {approx = true} : vector<2x8x1xf32> -> vector<2x8x1xf32>
    %110 = vector.broadcast %109 : vector<2x8x1xf32> to vector<2x8x8xf32>
    %111 = arith.mulf %106, %110 : vector<2x8x8xf32>
    "tpu.trace_start"() <{level = 10 : i32, message = "bqk,bkd->bqd"}> : () -> ()
    %cst_43 = arith.constant dense<0.000000e+00> : vector<2x8x16xf32>
    %112 = tpu.matmul %111, %96, %cst_43 {dimension_numbers = #tpu.dot_dimension_numbers<[2], [1], [1], [2], [0, 0, 0, 1, 1, 2], [0], [0]>} : vector<2x8x8xf32>, vector<2x8x16xf32>, vector<2x8x16xf32> -> vector<2x8x16xf32>
    "tpu.trace_stop"() : () -> ()
    %113 = vector.shape_cast %112 : vector<2x8x16xf32> to vector<16x16xf32>
    %114 = arith.truncf %113 : vector<16x16xf32> to vector<16x16xbf16>
    %115 = vector.extract_strided_slice %55 {offsets = [16, 0], sizes = [16, 32], strides = [1, 1]} : vector<32x32xbf16> to vector<16x32xbf16>
    %cst_44 = arith.constant dense<0.000000e+00> : vector<16x32xf32>
    %116 = tpu.matmul %114, %115, %cst_44 {dimension_numbers = #tpu.dot_dimension_numbers<[1], [0], [0], [1], [0, 0, 1, 1], [], []>} : vector<16x16xbf16>, vector<16x32xbf16>, vector<16x32xf32> -> vector<16x32xf32>
    %117 = arith.addf %90, %116 : vector<16x32xf32>
    %c4 = arith.constant 4 : index
    %c0_45 = arith.constant 0 : index
    %118 = vector.load %arg3[%c4, %c0_45] : memref<19x128xf32, #tpu.memory_space<vmem>>, vector<1x32xf32>
    %119 = vector.broadcast %118 : vector<1x32xf32> to vector<16x32xf32>
    %120 = arith.addf %117, %119 : vector<16x32xf32>
    %121 = arith.addf %120, %50 : vector<16x32xf32>
    %c5 = arith.constant 5 : index
    %c0_46 = arith.constant 0 : index
    %122 = vector.load %arg3[%c5, %c0_46] : memref<19x128xf32, #tpu.memory_space<vmem>>, vector<1x32xf32>
    %c6 = arith.constant 6 : index
    %c0_47 = arith.constant 0 : index
    %123 = vector.load %arg3[%c6, %c0_47] : memref<19x128xf32, #tpu.memory_space<vmem>>, vector<1x32xf32>
    %cst_48 = arith.constant dense<0.000000e+00> : vector<16xf32>
    %124 = vector.multi_reduction <add>, %121, %cst_48 [1] : vector<16x32xf32> to vector<16xf32>
    %125 = vector.shape_cast %124 : vector<16xf32> to vector<16x1xf32>
    %cst_49 = arith.constant 3.200000e+01 : f32
    %126 = vector.broadcast %cst_49 : f32 to vector<16x1xf32>
    %127 = arith.divf %125, %126 : vector<16x1xf32>
    %128 = vector.broadcast %127 : vector<16x1xf32> to vector<16x32xf32>
    %129 = arith.subf %121, %128 : vector<16x32xf32>
    %130 = arith.mulf %129, %129 : vector<16x32xf32>
    %cst_50 = arith.constant dense<0.000000e+00> : vector<16xf32>
    %131 = vector.multi_reduction <add>, %130, %cst_50 [1] : vector<16x32xf32> to vector<16xf32>
    %132 = vector.shape_cast %131 : vector<16xf32> to vector<16x1xf32>
    %cst_51 = arith.constant 3.200000e+01 : f32
    %133 = vector.broadcast %cst_51 : f32 to vector<16x1xf32>
    %134 = arith.divf %132, %133 : vector<16x1xf32>
    %135 = vector.broadcast %127 : vector<16x1xf32> to vector<16x32xf32>
    %136 = arith.subf %121, %135 : vector<16x32xf32>
    %cst_52 = arith.constant 9.99999996E-13 : f32
    %137 = vector.broadcast %cst_52 : f32 to vector<16x1xf32>
    %138 = arith.addf %134, %137 : vector<16x1xf32>
    %139 = math.rsqrt %138 : vector<16x1xf32>
    %140 = vector.broadcast %139 : vector<16x1xf32> to vector<16x32xf32>
    %141 = arith.mulf %136, %140 : vector<16x32xf32>
    %142 = vector.broadcast %122 : vector<1x32xf32> to vector<16x32xf32>
    %143 = arith.mulf %141, %142 : vector<16x32xf32>
    %144 = vector.broadcast %123 : vector<1x32xf32> to vector<16x32xf32>
    %145 = arith.addf %143, %144 : vector<16x32xf32>
    %146 = arith.truncf %145 : vector<16x32xf32> to vector<16x32xbf16>
    %cst_53 = arith.constant dense<0.000000e+00> : vector<16x64xf32>
    %147 = tpu.matmul %146, %57, %cst_53 {dimension_numbers = #tpu.dot_dimension_numbers<[1], [0], [0], [1], [0, 0, 1, 1], [], []>} : vector<16x32xbf16>, vector<32x64xbf16>, vector<16x64xf32> -> vector<16x64xf32>
    %c7 = arith.constant 7 : index
    %c0_54 = arith.constant 0 : index
    %148 = vector.load %arg3[%c7, %c0_54] : memref<19x128xf32, #tpu.memory_space<vmem>>, vector<1x64xf32>
    %149 = vector.broadcast %148 : vector<1x64xf32> to vector<16x64xf32>
    %150 = arith.addf %147, %149 : vector<16x64xf32>
    %151 = arith.mulf %150, %150 : vector<16x64xf32>
    %152 = arith.mulf %150, %151 : vector<16x64xf32>
    %cst_55 = arith.constant 4.471500e-02 : f32
    %153 = vector.broadcast %cst_55 : f32 to vector<16x64xf32>
    %154 = arith.mulf %153, %152 : vector<16x64xf32>
    %155 = arith.addf %150, %154 : vector<16x64xf32>
    %cst_56 = arith.constant 0.797884583 : f32
    %156 = vector.broadcast %cst_56 : f32 to vector<16x64xf32>
    %157 = arith.mulf %156, %155 : vector<16x64xf32>
    %158 = math.tanh %157 : vector<16x64xf32>
    %cst_57 = arith.constant 1.000000e+00 : f32
    %159 = vector.broadcast %cst_57 : f32 to vector<16x64xf32>
    %160 = arith.addf %159, %158 : vector<16x64xf32>
    %cst_58 = arith.constant 5.000000e-01 : f32
    %161 = vector.broadcast %cst_58 : f32 to vector<16x64xf32>
    %162 = arith.mulf %161, %160 : vector<16x64xf32>
    %163 = arith.mulf %150, %162 : vector<16x64xf32>
    %164 = arith.truncf %163 : vector<16x64xf32> to vector<16x64xbf16>
    %cst_59 = arith.constant dense<0.000000e+00> : vector<16x32xf32>
    %165 = tpu.matmul %164, %59, %cst_59 {dimension_numbers = #tpu.dot_dimension_numbers<[1], [0], [0], [1], [0, 0, 1, 1], [], []>} : vector<16x64xbf16>, vector<64x32xbf16>, vector<16x32xf32> -> vector<16x32xf32>
    %c8 = arith.constant 8 : index
    %c0_60 = arith.constant 0 : index
    %166 = vector.load %arg3[%c8, %c0_60] : memref<19x128xf32, #tpu.memory_space<vmem>>, vector<1x32xf32>
    %167 = vector.broadcast %166 : vector<1x32xf32> to vector<16x32xf32>
    %168 = arith.addf %165, %167 : vector<16x32xf32>
    %169 = arith.addf %168, %145 : vector<16x32xf32>
    %c9 = arith.constant 9 : index
    %c0_61 = arith.constant 0 : index
    %170 = vector.load %arg3[%c9, %c0_61] : memref<19x128xf32, #tpu.memory_space<vmem>>, vector<1x32xf32>
    %c10 = arith.constant 10 : index
    %c0_62 = arith.constant 0 : index
    %171 = vector.load %arg3[%c10, %c0_62] : memref<19x128xf32, #tpu.memory_space<vmem>>, vector<1x32xf32>
    %cst_63 = arith.constant dense<0.000000e+00> : vector<16xf32>
    %172 = vector.multi_reduction <add>, %169, %cst_63 [1] : vector<16x32xf32> to vector<16xf32>
    %173 = vector.shape_cast %172 : vector<16xf32> to vector<16x1xf32>
    %cst_64 = arith.constant 3.200000e+01 : f32
    %174 = vector.broadcast %cst_64 : f32 to vector<16x1xf32>
    %175 = arith.divf %173, %174 : vector<16x1xf32>
    %176 = vector.broadcast %175 : vector<16x1xf32> to vector<16x32xf32>
    %177 = arith.subf %169, %176 : vector<16x32xf32>
    %178 = arith.mulf %177, %177 : vector<16x32xf32>
    %cst_65 = arith.constant dense<0.000000e+00> : vector<16xf32>
    %179 = vector.multi_reduction <add>, %178, %cst_65 [1] : vector<16x32xf32> to vector<16xf32>
    %180 = vector.shape_cast %179 : vector<16xf32> to vector<16x1xf32>
    %cst_66 = arith.constant 3.200000e+01 : f32
    %181 = vector.broadcast %cst_66 : f32 to vector<16x1xf32>
    %182 = arith.divf %180, %181 : vector<16x1xf32>
    %183 = vector.broadcast %175 : vector<16x1xf32> to vector<16x32xf32>
    %184 = arith.subf %169, %183 : vector<16x32xf32>
    %cst_67 = arith.constant 9.99999996E-13 : f32
    %185 = vector.broadcast %cst_67 : f32 to vector<16x1xf32>
    %186 = arith.addf %182, %185 : vector<16x1xf32>
    %187 = math.rsqrt %186 : vector<16x1xf32>
    %188 = vector.broadcast %187 : vector<16x1xf32> to vector<16x32xf32>
    %189 = arith.mulf %184, %188 : vector<16x32xf32>
    %190 = vector.broadcast %170 : vector<1x32xf32> to vector<16x32xf32>
    %191 = arith.mulf %189, %190 : vector<16x32xf32>
    %192 = vector.broadcast %171 : vector<1x32xf32> to vector<16x32xf32>
    %193 = arith.addf %191, %192 : vector<16x32xf32>
    %c1_68 = arith.constant 1 : index
    %c0_69 = arith.constant 0 : index
    %c0_70 = arith.constant 0 : index
    %194 = vector.load %arg4[%c1_68, %c0_69, %c0_70] : memref<2x32x96xbf16, #tpu.memory_space<vmem>>, vector<1x32x96xbf16>
    %195 = vector.shape_cast %194 : vector<1x32x96xbf16> to vector<32x96xbf16>
    %c1_71 = arith.constant 1 : index
    %c0_72 = arith.constant 0 : index
    %c0_73 = arith.constant 0 : index
    %196 = vector.load %arg5[%c1_71, %c0_72, %c0_73] : memref<2x32x32xbf16, #tpu.memory_space<vmem>>, vector<1x32x32xbf16>
    %197 = vector.shape_cast %196 : vector<1x32x32xbf16> to vector<32x32xbf16>
    %c1_74 = arith.constant 1 : index
    %c0_75 = arith.constant 0 : index
    %c0_76 = arith.constant 0 : index
    %198 = vector.load %arg6[%c1_74, %c0_75, %c0_76] : memref<2x32x64xbf16, #tpu.memory_space<vmem>>, vector<1x32x64xbf16>
    %199 = vector.shape_cast %198 : vector<1x32x64xbf16> to vector<32x64xbf16>
    %c1_77 = arith.constant 1 : index
    %c0_78 = arith.constant 0 : index
    %c0_79 = arith.constant 0 : index
    %200 = vector.load %arg7[%c1_77, %c0_78, %c0_79] : memref<2x64x32xbf16, #tpu.memory_space<vmem>>, vector<1x64x32xbf16>
    %201 = vector.shape_cast %200 : vector<1x64x32xbf16> to vector<64x32xbf16>
    %202 = arith.truncf %193 : vector<16x32xf32> to vector<16x32xbf16>
    %cst_80 = arith.constant dense<0.000000e+00> : vector<16x96xf32>
    %203 = tpu.matmul %202, %195, %cst_80 {dimension_numbers = #tpu.dot_dimension_numbers<[1], [0], [0], [1], [0, 0, 1, 1], [], []>} : vector<16x32xbf16>, vector<32x96xbf16>, vector<16x96xf32> -> vector<16x96xf32>
    %c11 = arith.constant 11 : index
    %c0_81 = arith.constant 0 : index
    %204 = vector.load %arg3[%c11, %c0_81] : memref<19x128xf32, #tpu.memory_space<vmem>>, vector<1x96xf32>
    %205 = vector.broadcast %204 : vector<1x96xf32> to vector<16x96xf32>
    %206 = arith.addf %203, %205 : vector<16x96xf32>
    %207 = vector.extract_strided_slice %206 {offsets = [0, 0], sizes = [16, 16], strides = [1, 1]} : vector<16x96xf32> to vector<16x16xf32>
    %208 = vector.shape_cast %207 : vector<16x16xf32> to vector<2x8x16xf32>
    %209 = vector.extract_strided_slice %206 {offsets = [0, 32], sizes = [16, 16], strides = [1, 1]} : vector<16x96xf32> to vector<16x16xf32>
    %210 = vector.shape_cast %209 : vector<16x16xf32> to vector<2x8x16xf32>
    %211 = vector.extract_strided_slice %206 {offsets = [0, 64], sizes = [16, 16], strides = [1, 1]} : vector<16x96xf32> to vector<16x16xf32>
    %212 = vector.shape_cast %211 : vector<16x16xf32> to vector<2x8x16xf32>
    "tpu.trace_start"() <{level = 10 : i32, message = "bqd,bkd->bqk"}> : () -> ()
    %cst_82 = arith.constant dense<0.000000e+00> : vector<2x8x8xf32>
    %213 = tpu.matmul %208, %210, %cst_82 {dimension_numbers = #tpu.dot_dimension_numbers<[2], [2], [1], [1], [0, 0, 0, 1, 1, 1], [0], [0]>} : vector<2x8x16xf32>, vector<2x8x16xf32>, vector<2x8x8xf32> -> vector<2x8x8xf32>
    "tpu.trace_stop"() : () -> ()
    %cst_83 = arith.constant 2.500000e-01 : f32
    %214 = vector.broadcast %cst_83 : f32 to vector<2x8x8xf32>
    %215 = arith.mulf %213, %214 : vector<2x8x8xf32>
    %216 = vector.broadcast %51 : vector<2x1x8xf32> to vector<2x8x8xf32>
    %217 = arith.addf %215, %216 : vector<2x8x8xf32>
    %cst_84 = arith.constant dense<0xFF800000> : vector<2x8xf32>
    %218 = vector.multi_reduction <maximumf>, %217, %cst_84 [2] : vector<2x8x8xf32> to vector<2x8xf32>
    %219 = vector.shape_cast %218 : vector<2x8xf32> to vector<2x8x1xf32>
    %220 = vector.broadcast %219 : vector<2x8x1xf32> to vector<2x8x8xf32>
    %221 = arith.subf %217, %220 : vector<2x8x8xf32>
    %222 = math.exp %221 : vector<2x8x8xf32>
    %cst_85 = arith.constant dense<0.000000e+00> : vector<2x8xf32>
    %223 = vector.multi_reduction <add>, %222, %cst_85 [2] : vector<2x8x8xf32> to vector<2x8xf32>
    %224 = vector.shape_cast %223 : vector<2x8xf32> to vector<2x8x1xf32>
    %225 = tpu.reciprocal %224 {approx = true} : vector<2x8x1xf32> -> vector<2x8x1xf32>
    %226 = vector.broadcast %225 : vector<2x8x1xf32> to vector<2x8x8xf32>
    %227 = arith.mulf %222, %226 : vector<2x8x8xf32>
    "tpu.trace_start"() <{level = 10 : i32, message = "bqk,bkd->bqd"}> : () -> ()
    %cst_86 = arith.constant dense<0.000000e+00> : vector<2x8x16xf32>
    %228 = tpu.matmul %227, %212, %cst_86 {dimension_numbers = #tpu.dot_dimension_numbers<[2], [1], [1], [2], [0, 0, 0, 1, 1, 2], [0], [0]>} : vector<2x8x8xf32>, vector<2x8x16xf32>, vector<2x8x16xf32> -> vector<2x8x16xf32>
    "tpu.trace_stop"() : () -> ()
    %229 = vector.shape_cast %228 : vector<2x8x16xf32> to vector<16x16xf32>
    %230 = arith.truncf %229 : vector<16x16xf32> to vector<16x16xbf16>
    %231 = vector.extract_strided_slice %197 {offsets = [0, 0], sizes = [16, 32], strides = [1, 1]} : vector<32x32xbf16> to vector<16x32xbf16>
    %cst_87 = arith.constant dense<0.000000e+00> : vector<16x32xf32>
    %232 = tpu.matmul %230, %231, %cst_87 {dimension_numbers = #tpu.dot_dimension_numbers<[1], [0], [0], [1], [0, 0, 1, 1], [], []>} : vector<16x16xbf16>, vector<16x32xbf16>, vector<16x32xf32> -> vector<16x32xf32>
    %233 = vector.extract_strided_slice %206 {offsets = [0, 16], sizes = [16, 16], strides = [1, 1]} : vector<16x96xf32> to vector<16x16xf32>
    %234 = vector.shape_cast %233 : vector<16x16xf32> to vector<2x8x16xf32>
    %235 = vector.extract_strided_slice %206 {offsets = [0, 48], sizes = [16, 16], strides = [1, 1]} : vector<16x96xf32> to vector<16x16xf32>
    %236 = vector.shape_cast %235 : vector<16x16xf32> to vector<2x8x16xf32>
    %237 = vector.extract_strided_slice %206 {offsets = [0, 80], sizes = [16, 16], strides = [1, 1]} : vector<16x96xf32> to vector<16x16xf32>
    %238 = vector.shape_cast %237 : vector<16x16xf32> to vector<2x8x16xf32>
    "tpu.trace_start"() <{level = 10 : i32, message = "bqd,bkd->bqk"}> : () -> ()
    %cst_88 = arith.constant dense<0.000000e+00> : vector<2x8x8xf32>
    %239 = tpu.matmul %234, %236, %cst_88 {dimension_numbers = #tpu.dot_dimension_numbers<[2], [2], [1], [1], [0, 0, 0, 1, 1, 1], [0], [0]>} : vector<2x8x16xf32>, vector<2x8x16xf32>, vector<2x8x8xf32> -> vector<2x8x8xf32>
    "tpu.trace_stop"() : () -> ()
    %cst_89 = arith.constant 2.500000e-01 : f32
    %240 = vector.broadcast %cst_89 : f32 to vector<2x8x8xf32>
    %241 = arith.mulf %239, %240 : vector<2x8x8xf32>
    %242 = vector.broadcast %51 : vector<2x1x8xf32> to vector<2x8x8xf32>
    %243 = arith.addf %241, %242 : vector<2x8x8xf32>
    %cst_90 = arith.constant dense<0xFF800000> : vector<2x8xf32>
    %244 = vector.multi_reduction <maximumf>, %243, %cst_90 [2] : vector<2x8x8xf32> to vector<2x8xf32>
    %245 = vector.shape_cast %244 : vector<2x8xf32> to vector<2x8x1xf32>
    %246 = vector.broadcast %245 : vector<2x8x1xf32> to vector<2x8x8xf32>
    %247 = arith.subf %243, %246 : vector<2x8x8xf32>
    %248 = math.exp %247 : vector<2x8x8xf32>
    %cst_91 = arith.constant dense<0.000000e+00> : vector<2x8xf32>
    %249 = vector.multi_reduction <add>, %248, %cst_91 [2] : vector<2x8x8xf32> to vector<2x8xf32>
    %250 = vector.shape_cast %249 : vector<2x8xf32> to vector<2x8x1xf32>
    %251 = tpu.reciprocal %250 {approx = true} : vector<2x8x1xf32> -> vector<2x8x1xf32>
    %252 = vector.broadcast %251 : vector<2x8x1xf32> to vector<2x8x8xf32>
    %253 = arith.mulf %248, %252 : vector<2x8x8xf32>
    "tpu.trace_start"() <{level = 10 : i32, message = "bqk,bkd->bqd"}> : () -> ()
    %cst_92 = arith.constant dense<0.000000e+00> : vector<2x8x16xf32>
    %254 = tpu.matmul %253, %238, %cst_92 {dimension_numbers = #tpu.dot_dimension_numbers<[2], [1], [1], [2], [0, 0, 0, 1, 1, 2], [0], [0]>} : vector<2x8x8xf32>, vector<2x8x16xf32>, vector<2x8x16xf32> -> vector<2x8x16xf32>
    "tpu.trace_stop"() : () -> ()
    %255 = vector.shape_cast %254 : vector<2x8x16xf32> to vector<16x16xf32>
    %256 = arith.truncf %255 : vector<16x16xf32> to vector<16x16xbf16>
    %257 = vector.extract_strided_slice %197 {offsets = [16, 0], sizes = [16, 32], strides = [1, 1]} : vector<32x32xbf16> to vector<16x32xbf16>
    %cst_93 = arith.constant dense<0.000000e+00> : vector<16x32xf32>
    %258 = tpu.matmul %256, %257, %cst_93 {dimension_numbers = #tpu.dot_dimension_numbers<[1], [0], [0], [1], [0, 0, 1, 1], [], []>} : vector<16x16xbf16>, vector<16x32xbf16>, vector<16x32xf32> -> vector<16x32xf32>
    %259 = arith.addf %232, %258 : vector<16x32xf32>
    %c12 = arith.constant 12 : index
    %c0_94 = arith.constant 0 : index
    %260 = vector.load %arg3[%c12, %c0_94] : memref<19x128xf32, #tpu.memory_space<vmem>>, vector<1x32xf32>
    %261 = vector.broadcast %260 : vector<1x32xf32> to vector<16x32xf32>
    %262 = arith.addf %259, %261 : vector<16x32xf32>
    %263 = arith.addf %262, %193 : vector<16x32xf32>
    %c13 = arith.constant 13 : index
    %c0_95 = arith.constant 0 : index
    %264 = vector.load %arg3[%c13, %c0_95] : memref<19x128xf32, #tpu.memory_space<vmem>>, vector<1x32xf32>
    %c14 = arith.constant 14 : index
    %c0_96 = arith.constant 0 : index
    %265 = vector.load %arg3[%c14, %c0_96] : memref<19x128xf32, #tpu.memory_space<vmem>>, vector<1x32xf32>
    %cst_97 = arith.constant dense<0.000000e+00> : vector<16xf32>
    %266 = vector.multi_reduction <add>, %263, %cst_97 [1] : vector<16x32xf32> to vector<16xf32>
    %267 = vector.shape_cast %266 : vector<16xf32> to vector<16x1xf32>
    %cst_98 = arith.constant 3.200000e+01 : f32
    %268 = vector.broadcast %cst_98 : f32 to vector<16x1xf32>
    %269 = arith.divf %267, %268 : vector<16x1xf32>
    %270 = vector.broadcast %269 : vector<16x1xf32> to vector<16x32xf32>
    %271 = arith.subf %263, %270 : vector<16x32xf32>
    %272 = arith.mulf %271, %271 : vector<16x32xf32>
    %cst_99 = arith.constant dense<0.000000e+00> : vector<16xf32>
    %273 = vector.multi_reduction <add>, %272, %cst_99 [1] : vector<16x32xf32> to vector<16xf32>
    %274 = vector.shape_cast %273 : vector<16xf32> to vector<16x1xf32>
    %cst_100 = arith.constant 3.200000e+01 : f32
    %275 = vector.broadcast %cst_100 : f32 to vector<16x1xf32>
    %276 = arith.divf %274, %275 : vector<16x1xf32>
    %277 = vector.broadcast %269 : vector<16x1xf32> to vector<16x32xf32>
    %278 = arith.subf %263, %277 : vector<16x32xf32>
    %cst_101 = arith.constant 9.99999996E-13 : f32
    %279 = vector.broadcast %cst_101 : f32 to vector<16x1xf32>
    %280 = arith.addf %276, %279 : vector<16x1xf32>
    %281 = math.rsqrt %280 : vector<16x1xf32>
    %282 = vector.broadcast %281 : vector<16x1xf32> to vector<16x32xf32>
    %283 = arith.mulf %278, %282 : vector<16x32xf32>
    %284 = vector.broadcast %264 : vector<1x32xf32> to vector<16x32xf32>
    %285 = arith.mulf %283, %284 : vector<16x32xf32>
    %286 = vector.broadcast %265 : vector<1x32xf32> to vector<16x32xf32>
    %287 = arith.addf %285, %286 : vector<16x32xf32>
    %288 = arith.truncf %287 : vector<16x32xf32> to vector<16x32xbf16>
    %cst_102 = arith.constant dense<0.000000e+00> : vector<16x64xf32>
    %289 = tpu.matmul %288, %199, %cst_102 {dimension_numbers = #tpu.dot_dimension_numbers<[1], [0], [0], [1], [0, 0, 1, 1], [], []>} : vector<16x32xbf16>, vector<32x64xbf16>, vector<16x64xf32> -> vector<16x64xf32>
    %c15 = arith.constant 15 : index
    %c0_103 = arith.constant 0 : index
    %290 = vector.load %arg3[%c15, %c0_103] : memref<19x128xf32, #tpu.memory_space<vmem>>, vector<1x64xf32>
    %291 = vector.broadcast %290 : vector<1x64xf32> to vector<16x64xf32>
    %292 = arith.addf %289, %291 : vector<16x64xf32>
    %293 = arith.mulf %292, %292 : vector<16x64xf32>
    %294 = arith.mulf %292, %293 : vector<16x64xf32>
    %cst_104 = arith.constant 4.471500e-02 : f32
    %295 = vector.broadcast %cst_104 : f32 to vector<16x64xf32>
    %296 = arith.mulf %295, %294 : vector<16x64xf32>
    %297 = arith.addf %292, %296 : vector<16x64xf32>
    %cst_105 = arith.constant 0.797884583 : f32
    %298 = vector.broadcast %cst_105 : f32 to vector<16x64xf32>
    %299 = arith.mulf %298, %297 : vector<16x64xf32>
    %300 = math.tanh %299 : vector<16x64xf32>
    %cst_106 = arith.constant 1.000000e+00 : f32
    %301 = vector.broadcast %cst_106 : f32 to vector<16x64xf32>
    %302 = arith.addf %301, %300 : vector<16x64xf32>
    %cst_107 = arith.constant 5.000000e-01 : f32
    %303 = vector.broadcast %cst_107 : f32 to vector<16x64xf32>
    %304 = arith.mulf %303, %302 : vector<16x64xf32>
    %305 = arith.mulf %292, %304 : vector<16x64xf32>
    %306 = arith.truncf %305 : vector<16x64xf32> to vector<16x64xbf16>
    %cst_108 = arith.constant dense<0.000000e+00> : vector<16x32xf32>
    %307 = tpu.matmul %306, %201, %cst_108 {dimension_numbers = #tpu.dot_dimension_numbers<[1], [0], [0], [1], [0, 0, 1, 1], [], []>} : vector<16x64xbf16>, vector<64x32xbf16>, vector<16x32xf32> -> vector<16x32xf32>
    %c16 = arith.constant 16 : index
    %c0_109 = arith.constant 0 : index
    %308 = vector.load %arg3[%c16, %c0_109] : memref<19x128xf32, #tpu.memory_space<vmem>>, vector<1x32xf32>
    %309 = vector.broadcast %308 : vector<1x32xf32> to vector<16x32xf32>
    %310 = arith.addf %307, %309 : vector<16x32xf32>
    %311 = arith.addf %310, %287 : vector<16x32xf32>
    %c17 = arith.constant 17 : index
    %c0_110 = arith.constant 0 : index
    %312 = vector.load %arg3[%c17, %c0_110] : memref<19x128xf32, #tpu.memory_space<vmem>>, vector<1x32xf32>
    %c18 = arith.constant 18 : index
    %c0_111 = arith.constant 0 : index
    %313 = vector.load %arg3[%c18, %c0_111] : memref<19x128xf32, #tpu.memory_space<vmem>>, vector<1x32xf32>
    %cst_112 = arith.constant dense<0.000000e+00> : vector<16xf32>
    %314 = vector.multi_reduction <add>, %311, %cst_112 [1] : vector<16x32xf32> to vector<16xf32>
    %315 = vector.shape_cast %314 : vector<16xf32> to vector<16x1xf32>
    %cst_113 = arith.constant 3.200000e+01 : f32
    %316 = vector.broadcast %cst_113 : f32 to vector<16x1xf32>
    %317 = arith.divf %315, %316 : vector<16x1xf32>
    %318 = vector.broadcast %317 : vector<16x1xf32> to vector<16x32xf32>
    %319 = arith.subf %311, %318 : vector<16x32xf32>
    %320 = arith.mulf %319, %319 : vector<16x32xf32>
    %cst_114 = arith.constant dense<0.000000e+00> : vector<16xf32>
    %321 = vector.multi_reduction <add>, %320, %cst_114 [1] : vector<16x32xf32> to vector<16xf32>
    %322 = vector.shape_cast %321 : vector<16xf32> to vector<16x1xf32>
    %cst_115 = arith.constant 3.200000e+01 : f32
    %323 = vector.broadcast %cst_115 : f32 to vector<16x1xf32>
    %324 = arith.divf %322, %323 : vector<16x1xf32>
    %325 = vector.broadcast %317 : vector<16x1xf32> to vector<16x32xf32>
    %326 = arith.subf %311, %325 : vector<16x32xf32>
    %cst_116 = arith.constant 9.99999996E-13 : f32
    %327 = vector.broadcast %cst_116 : f32 to vector<16x1xf32>
    %328 = arith.addf %324, %327 : vector<16x1xf32>
    %329 = math.rsqrt %328 : vector<16x1xf32>
    %330 = vector.broadcast %329 : vector<16x1xf32> to vector<16x32xf32>
    %331 = arith.mulf %326, %330 : vector<16x32xf32>
    %332 = vector.broadcast %312 : vector<1x32xf32> to vector<16x32xf32>
    %333 = arith.mulf %331, %332 : vector<16x32xf32>
    %334 = vector.broadcast %313 : vector<1x32xf32> to vector<16x32xf32>
    %335 = arith.addf %333, %334 : vector<16x32xf32>
    %336 = vector.shape_cast %335 : vector<16x32xf32> to vector<2x8x32xf32>
    %cst_117 = arith.constant dense<0.000000e+00> : vector<2x32xf32>
    %337 = vector.multi_reduction <add>, %336, %cst_117 [1] : vector<2x8x32xf32> to vector<2x32xf32>
    %338 = vector.extract_strided_slice %336 {offsets = [0, 0, 0], sizes = [2, 1, 32], strides = [1, 1, 1]} : vector<2x8x32xf32> to vector<2x1x32xf32>
    %339 = vector.shape_cast %338 : vector<2x1x32xf32> to vector<2x32xf32>
    %340 = arith.subf %337, %339 : vector<2x32xf32>
    %cst_118 = arith.constant 0.142857149 : f32
    %341 = vector.broadcast %cst_118 : f32 to vector<2x32xf32>
    %342 = arith.mulf %340, %341 : vector<2x32xf32>
    %c0_119 = arith.constant 0 : index
    %c0_120 = arith.constant 0 : index
    %343 = vector.load %arg8[%c0_119, %c0_120] : memref<32x128xf32, #tpu.memory_space<vmem>>, vector<32x128xf32>
    %cst_121 = arith.constant dense<0.000000e+00> : vector<2x128xf32>
    %344 = tpu.matmul %342, %343, %cst_121 {dimension_numbers = #tpu.dot_dimension_numbers<[1], [0], [0], [1], [0, 0, 1, 1], [], []>} : vector<2x32xf32>, vector<32x128xf32>, vector<2x128xf32> -> vector<2x128xf32>
    %c2 = arith.constant 2 : index
    %c0_122 = arith.constant 0 : index
    %345 = vector.load %arg3[%c2, %c0_122] : memref<19x128xf32, #tpu.memory_space<vmem>>, vector<1x128xf32>
    %346 = vector.broadcast %345 : vector<1x128xf32> to vector<2x128xf32>
    %347 = arith.addf %344, %346 : vector<2x128xf32>
    %c0_123 = arith.constant 0 : index
    %c0_124 = arith.constant 0 : index
    %348 = vector.load %arg9[%c0_123, %c0_124] : memref<2x128xf32, #tpu.memory_space<vmem>>, vector<2x128xf32>
    tpu.vector_store %arg9[%c0_123, %c0_124], %347 {strides = array<i32>} : memref<2x128xf32, #tpu.memory_space<vmem>>, vector<2x128xf32>,
    return
  }
}

</mosaic_0001>

<bundles_post_ra>
// kernel: tpu_custom_call.1
= control target key start
LH: loop header
LB: loop body
LE: loop exit
PB: predicated region body
PF: predicated region fallthrough
CT: control target
= control target key end

     0   :  { %v3090_v2 = vmov 0   ;;  %v3091_v14 = vmov 1   ;;  %s3605_s0 = inlined_call_operand.vmem [shape: s32[16,2], index: 0, kind: input, shape index: {}]   ;;  %s3606_s1 = inlined_call_operand.vmem [shape: f32[2,1,8], index: 1, kind: input, shape index: {}]   ;;  %s3607_s2 = inlined_call_operand.vmem [shape: f32[146,32], index: 2, kind: input, shape index: {}]   ;;  %s3608_s3 = inlined_call_operand.vmem [shape: f32[19,128], index: 3, kind: input, shape index: {}]   ;;  %s3609_s4 = inlined_call_operand.vmem [shape: bf16[2,32,96], index: 4, kind: input, shape index: {}]   ;;  %s3610_s5 = inlined_call_operand.vmem [shape: bf16[2,32,32], index: 5, kind: input, shape index: {}]   ;;  %s3611_s6 = inlined_call_operand.vmem [shape: bf16[2,32,64], index: 6, kind: input, shape index: {}]   ;;  %s3612_s7 = inlined_call_operand.vmem [shape: bf16[2,64,32], index: 7, kind: input, shape index: {}]   ;;  %s3613_s8 = inlined_call_operand.vmem [shape: f32[32,128], index: 8, kind: input, shape index: {}]   ;;  %s3614_s9 = inlined_call_operand.hbm [shape: f32[2,128], index: 9, kind: output, shape index: {}]  }
   0x1   :  { %v34_v0 = vld [vmem:[%s3605_s0] sm:$0xff]  ;;  %2983 = vset.pattern.permute.xlu0 %v3090_v2  ;;  %v51_v3 = vld [vmem:[%s3607_s2 + $0x8] sm:$0xff]  ;;  %v52_v4 = vld [vmem:[%s3607_s2 + $0x10] sm:$0xff]  ;;  %2984 = vset.pattern.permute.xlu1 %v3091_v14 }
   0x2   :  { %v50_v1 = vld [vmem:[%s3607_s2] sm:$0xff]  ;;  %v53_v5 = vld [vmem:[%s3607_s2 + $0x18] sm:$0xff]  ;;  %39 = vperm.xlu0 %2983, %v34_v0   ;;  %v35_v8 = vld [vmem:[%s3605_s0 + $0x8] sm:$0xff]  ;;  %vm68_vm0 = vcmp.eq.s32.totalorder %v34_v0, 0 }
   0x3   :  { %v2933_v6 = vpack.c.bf16 %v51_v3, %v50_v1  ;;  %v2937_v7 = vpack.c.bf16 %v53_v5, %v52_v4  ;;  %v54_v9 = vld [vmem:[%s3607_s2 + $0x20] sm:$0xff]  ;;  %v55_v10 = vld [vmem:[%s3607_s2 + $0x28] sm:$0xff]  ;;  %v56_v11 = vld [vmem:[%s3607_s2 + $0x30] sm:$0xff]  ;;  %vm69_vm1 = vcmp.eq.s32.totalorder %v35_v8, 0  ;;  %v70_v15 = vsel %vm68_vm0, 1, %v3090_v2 }
   0x4   :  { %v2941_v12 = vpack.c.bf16 %v55_v10, %v54_v9  ;;  %v57_v13 = vld [vmem:[%s3607_s2 + $0x38] sm:$0xff]  ;;  %v71_v16 = vsel %vm69_vm1, 1, %v3090_v2  ;;  %v58_v17 = vld [vmem:[%s3607_s2 + $0x40] sm:$0xff]  ;;  %v59_v18 = vld [vmem:[%s3607_s2 + $0x48] sm:$0xff]  ;;  %73 = vperm.xlu1 %2984, %v70_v15  }
   0x5   :  { %2934 = vmatprep.subr.bf16.mxu0 %v2933_v6  ;;  %v2945_v19 = vpack.c.bf16 %v57_v13, %v56_v11  ;;  %v60_v20 = vld [vmem:[%s3607_s2 + $0x50] sm:$0xff]  ;;  %v61_v21 = vld [vmem:[%s3607_s2 + $0x58] sm:$0xff]  ;;  %v2949_v22 = vpack.c.bf16 %v59_v18, %v58_v17  ;;  %v62_v23 = vld [vmem:[%s3607_s2 + $0x60] sm:$0xff] }
   0x6   :  { %2936 = vmatpush3.bf16.msra.mxu0 %v2933_v6  ;;  %42 = vperm.xlu0 %2983, %v35_v8   ;;  %v63_v24 = vld [vmem:[%s3607_s2 + $0x68] sm:$0xff]  ;;  %v2953_v25 = vpack.c.bf16 %v61_v21, %v60_v20 }
   0x7   :  { %2938 = vmatprep.subr.bf16.mxu0 %v2937_v7 }
   0x8   :  { %76 = vperm.xlu1 %2984, %v71_v16  }
   0xa   :  { %2940 = vmatpush3.bf16.msra.mxu0 %v2937_v7  ;;  %2985 = vset.pattern.permute.xlu0 %v3091_v14 }
   0xb   :  { %2942 = vmatprep.subr.bf16.mxu0 %v2941_v12 }
   0xe   :  { %2944 = vmatpush3.bf16.msra.mxu0 %v2941_v12 }
   0xf   :  { %2946 = vmatprep.subr.bf16.mxu0 %v2945_v19 }
  0x12   :  { %2948 = vmatpush3.bf16.msra.mxu0 %v2945_v19 }
  0x13   :  { %2950 = vmatprep.subr.bf16.mxu0 %v2949_v22 }
  0x16   :  { %2952 = vmatpush3.bf16.msra.mxu0 %v2949_v22 }
  0x17   :  { %14 = vsyncpa [#allocation3], 0  ;;  %2954 = vmatprep.subr.bf16.mxu0 %v2953_v25  ;;  %v2957_v26 = vpack.c.bf16 %v63_v24, %v62_v23  ;;  %v64_v27 = vld [vmem:[%s3607_s2 + $0x70] sm:$0xff]  ;;  %v65_v28 = vld [vmem:[%s3607_s2 + $0x78] sm:$0xff]  ;;  %v36_v30 = vlaneseq  ;;  %v3092_v33 = vmov 1.0   ;;  %vm170_vm6 = vcmask 261120  }
  0x18   :  { %v2961_v29 = vpack.c.bf16 %v65_v28, %v64_v27  ;;  %v2542_v37 = vld [vmem:[%s3607_s2 + $0x90] ss:$0 sm:$0xff]  ;;  %v2543_v38 = vld [vmem:[%s3607_s2 + $0x91] ss:$0 sm:$0xff]  ;;  %v165_v42 = vld [vmem:[%s3607_s2 + $0x80] sm:$0xff]  ;;  %v3093_v61 = vmov 0.0  }
  0x19   :  { %v37_v31 = vand.u32 127, %v36_v30  ;;  %v2986_v60 = vld [vmem:[%s3609_s4] sm:$0xff]   ;;  %2762 = vmatprep.subr.bf16.mxu1 %v3093_v61  ;;  %v2987_v62 = vld [vmem:[%s3609_s4 + $0x8] sm:$0xff]   ;;  %vm3094_vm7 = vmmov 0   ;;  %s3095_s16 = smov 96   ;;  %vm297_vm8 = vcmask 130048  }
  0x1a   :  { %2956 = vmatpush3.bf16.msra.mxu0 %v2953_v25  ;;  %2763 = vmatpush3.bf16.msra.mxu1 %v2986_v60  ;;  %v2546_v7 = vld [vmem:[%s3608_s3] ss:$0 sm:$0xff]  ;;  %v2547_v11 = vld [vmem:[%s3608_s3 + $0x1] ss:$0 sm:$0xff]  ;;  %v2548_v16 = vld [vmem:[%s3608_s3 + $0x3] ss:$0 sm:$0xff] }
  0x1b   :  { %2958 = vmatprep.subr.bf16.mxu0 %v2957_v26  ;;  %2766 = vmatprep.mubr.msk.bf16.mxu1 %vm3094_vm7, %v3093_v61  ;;  %vm465_vm9 = vcmask 64512   ;;  %s3096_s21 = smov 64   ;;  %s3098_s22 = smov 112   ;;  %vm1235_vm10 = vcmask 523264   ;;  %vm2451_vm11 = vcmask 1041409  }
  0x1c   :  { %2764 = vmatprep.subr.bf16.mxu1 %v3093_v61  ;;  %s3099_s23 = smov 48   ;;  %s3101_s26 = smov [#allocation2]  }
  0x1e   :  { %2960 = vmatpush3.bf16.msra.mxu0 %v2957_v26  ;;  %2765 = vmatpush3.bf16.msra.mxu1 %v2987_v62  ;;  %v3274_v26 = vld [vmem:[%s3606_s1] ss:$0 sm:$0xff] }
  0x1f   :  { %2962 = vmatprep.subr.bf16.mxu0 %v2961_v29  ;;  %2770 = vmatprep.subr.mxu1 %v3093_v61 }
  0x22   :  { %2964 = vmatpush3.bf16.msra.mxu0 %v2961_v29 }
  0x23   :  { %2805 = vmatprep.subr.mxu0 %v3093_v61 }
  0x81   :  { %v40_v32 = vpop.permute.xlu0 %39 }
  0x82   :  { %vm44_vm2 = vcmp.eq.s32.totalorder %v40_v32, %v37_v31 }
  0x83   :  { %2759 = vmatprep.mubr.msk.f32.mxu0 %vm44_vm2, %v3092_v33  ;;  %v74_v35 = vpop.permute.xlu1 %73 }
  0x84   :  { %vm78_vm5 = vcmp.eq.s32.totalorder %v74_v35, 1 }
  0x85   :  { %v43_v34 = vpop.permute.xlu0 %42  ;;  %v88_v40 = vsel %vm78_vm5, %v2542_v37, %v2543_v38 }
  0x86   :  { %vm45_vm3 = vcmp.eq.s32.totalorder %v43_v34, %v37_v31  ;;  %v3280_v31 = vld [vmem:[%s3606_s1 + $0x1] ss:$0 sm:$0xff]  ;;  %s3097_s1 = smov 80  }
  0x87   :  { %2760 = vmatmul.mubr.msk.f32.vlgmr.msra.gmra.mrb[0].mxu0 %vm45_vm3, %v3092_v33  ;;  %v77_v36 = vpop.permute.xlu1 %76 }
  0x88   :  { %vm79_vm4 = vcmp.eq.s32.totalorder %v77_v36, 1  ;;  %2807 = vmatprep.mubr.msk.f32.mxu0 %vm3094_vm7, %v3093_v61 }
  0x89   :  { %v89_v39 = vsel %vm79_vm4, %v2542_v37, %v2543_v38 }
 0x15a   :  { %v2761_v41 = vpop.f32.mrb[0].mxu0 }
 0x15b   :  { %v162_v43 = vadd.f32 %v2761_v41, %v89_v39  ;;  %v156_v44 = vpop.f32.mrb[1].mxu0 }
 0x15c   :  { %v157_v45 = vadd.f32 %v156_v44, %v88_v40 }
 0x15d   :  { %v167_v46 = vadd.f32 %v165_v42, %v162_v43 }
 0x15e   :  { %v166_v47 = vadd.f32 %v165_v42, %v157_v45 }
 0x15f   :  { %v174_v48 = vsel %vm170_vm6, %v167_v46, 0.0 }
 0x160   :  { %175 = vadd.xlane.f32.xlu1 %v174_v48  ;;  %v171_v49 = vsel %vm170_vm6, %v166_v47, 0.0 }
 0x161   :  { %172 = vadd.xlane.f32.xlu0 %v171_v49 }
 0x1ed   :  { %v176_v50 = vpop.xlane.xlu1 %175 }
 0x1ee   :  { %v179_v51 = vmul.f32 0.03125, %v176_v50  ;;  %v173_v52 = vpop.xlane.xlu0 %172 }
 0x1ef   :  { %v178_v53 = vmul.f32 0.03125, %v173_v52 }
 0x1f0   :  { %v181_v54 = vsub.f32 %v167_v46, %v179_v51 }
 0x1f1   :  { %v180_v55 = vsub.f32 %v166_v47, %v178_v53 }
 0x1f2   :  { %v183_v58 = vmul.f32 %v181_v54, %v181_v54 }
 0x1f3   :  { %v182_v56 = vmul.f32 %v180_v55, %v180_v55 }
 0x1f4   :  { %v187_v59 = vsel %vm170_vm6, %v183_v58, 0.0 }
 0x1f5   :  { %v184_v57 = vsel %vm170_vm6, %v182_v56, 0.0 }
 0x1f6   :  { %185 = vadd.xlane.f32.xlu0 %v184_v57 }
 0x1fa   :  { %188 = vadd.xlane.f32.xlu0 %v187_v59 }
 0x283   :  { %v186_v63 = vpop.xlane.xlu0 %185 }
 0x284   :  { %v190_v0 = vmul.f32 0.03125, %v186_v63 }
 0x286   :  { %v192_v1 = vadd.f32 1e-12, %v190_v0 }
 0x287   :  { %v189_v2 = vpop.xlane.xlu0 %188 }
 0x288   :  { %3006 = vrsqrt.f32 %v192_v1  ;;  %v191_v3 = vmul.f32 0.03125, %v189_v2 }
 0x28a   :  { %v193_v4 = vadd.f32 1e-12, %v191_v3 }
 0x28c   :  { %3008 = vrsqrt.f32 %v193_v4 }
 0x292   :  { %v3007_v5 = vpop.eup %3006 }
 0x293   :  { %v196_v6 = vmul.f32 %v3007_v5, %v180_v55 }
 0x295   :  { %v202_v10 = vmul.f32 %v2546_v7, %v196_v6 }
 0x296   :  { %v3009_v8 = vpop.eup %3008 }
 0x297   :  { %v197_v9 = vmul.f32 %v3009_v8, %v181_v54  ;;  %v3239_v13 = vadd.f32 %v2547_v11, %v202_v10 }
 0x299   :  { %v203_v12 = vmul.f32 %v2546_v7, %v197_v9 }
 0x29b   :  { %v3241_v14 = vadd.f32 %v2547_v11, %v203_v12 }
 0x29d   :  { %v232_v15 = vpack.c.bf16 %v3241_v14, %v3239_v13 }
 0x29f   :  { %2767 = vmatmul.mubr.msk.bf16.vlgmr.msra.gmra.mrb[0].mxu1 %vm170_vm6, %v232_v15 }
 0x2a0   :  { %2772 = vmatprep.mubr.msk.f32.mxu1 %vm3094_vm7, %v3093_v61 }
 0x372   :  { %v287_v17 = vpop.f32.mrb[0].mxu1 }
 0x373   :  { %v3251_v18 = vadd.f32 %v2548_v16, %v287_v17  ;;  %v2768_v19 = vpop.f32.mrb[1].mxu1 }
 0x374   :  { %v290_v20 = vpop.f32.mrb[2].mxu1 }
 0x375   :  { %v3253_v21 = vadd.f32 %v2548_v16, %v290_v20  ;;  %295 = vrot.lane.b32.xlu1 %v3251_v18, %s3095_s16  ;;  %v2769_v22 = vpop.f32.mrb[3].mxu1 }
 0x377   :  { %373 = vrot.lane.b32.xlu0 %v3253_v21, %s3095_s16 }
 0x3e7   :  { %v296_v23 = vpop.permute.xlu1 %295 }
 0x3e8   :  { %2771 = vmatpush3.xpose.msk.msra.mxu1 %vm297_vm8, %v296_v23 }
 0x3e9   :  { %2775 = vmatprep.subr.mxu1 %v3093_v61  ;;  %v374_v24 = vpop.permute.xlu0 %373 }
 0x3eb   :  { %2773 = vmatmul.mubr.msk.f32.vlgmr.msra.gmra.mrb[4].mxu1 %vm297_vm8, %v3251_v18 }
 0x3ec   :  { %2776 = vmatpush3.xpose.msk.msra.mxu1 %vm297_vm8, %v374_v24  ;;  %2777 = vmatprep.mubr.msk.f32.mxu1 %vm3094_vm7, %v3093_v61 }
 0x3ed   :  { %2780 = vmatprep.subr.mxu1 %v3093_v61 }
 0x3ef   :  { %2778 = vmatmul.mubr.msk.f32.vlgmr.msra.gmra.mrb[6].mxu1 %vm297_vm8, %v3253_v21 }
 0x3f0   :  { %2782 = vmatprep.mubr.msk.f32.mxu1 %vm3094_vm7, %v3093_v61 }
 0x4be   :  { %v368_v25 = vpop.f32.mrb[4].mxu1 }
 0x4bf   :  { %v449_v27 = vmul.f32 0.25, %v368_v25  ;;  %v2774_v28 = vpop.f32.mrb[5].mxu1 }
 0x4c1   :  { %v463_v29 = vadd.f32 %v3274_v26, %v449_v27 }
 0x4c2   :  { %v445_v30 = vpop.f32.mrb[6].mxu1 }
 0x4c3   :  { %v450_v32 = vmul.f32 0.25, %v445_v30  ;;  %v2779_v33 = vpop.f32.mrb[7].mxu1  ;;  %v466_v34 = vsel %vm465_vm9, %v463_v29, -inf }
 0x4c4   :  { %467 = vmax.xlane.f32.xlu1 %v466_v34  ;;  %v2988_v33 = vld [vmem:[%s3610_s5] sm:$0xff]   ;;  %v2989_v34 = vld [vmem:[%s3610_s5 + $0x8] sm:$0xff]  }
 0x4c5   :  { %v464_v35 = vadd.f32 %v3280_v31, %v450_v32 }
 0x4c7   :  { %v469_v36 = vsel %vm465_vm9, %v464_v35, -inf }
 0x4c8   :  { %470 = vmax.xlane.f32.xlu0 %v469_v36 }
 0x4d5   :  { %488 = vrot.lane.b32.xlu1 %v3251_v18, %s3096_s21 }
 0x551   :  { %v468_v37 = vpop.xlane.xlu1 %467 }
 0x552   :  { %v472_v38 = vsub.f32 %v463_v29, %v468_v37 }
 0x554   :  { %v474_v39 = vmul.f32 1.442695, %v472_v38 }
 0x555   :  { %v489_v40 = vpop.permute.xlu1 %488  ;;  %v471_v41 = vpop.xlane.xlu0 %470 }
 0x556   :  { %3010 = vpow2.f32 %v474_v39  ;;  %v473_v42 = vsub.f32 %v464_v35, %v471_v41  ;;  %2781 = vmatpush3.msra.mxu1 %v489_v40 }
 0x557   :  { %2785 = vmatprep.subr.mxu1 %v3093_v61 }
 0x558   :  { %v476_v43 = vmul.f32 1.442695, %v473_v42 }
 0x55a   :  { %3012 = vpow2.f32 %v476_v43 }
 0x560   :  { %v3011_v44 = vpop.eup %3010 }
 0x561   :  { %v478_v45 = vsel %vm465_vm9, %v3011_v44, 0.0 }
 0x562   :  { %479 = vadd.xlane.f32.xlu1 %v478_v45  ;;  %v2570_v45 = vld [vmem:[%s3608_s3 + $0x4] ss:$0 sm:$0xff] }
 0x564   :  { %v3013_v46 = vpop.eup %3012 }
 0x565   :  { %v481_v47 = vsel %vm465_vm9, %v3013_v46, 0.0 }
 0x566   :  { %482 = vadd.xlane.f32.xlu0 %v481_v47 }
 0x573   :  { %643 = vrot.lane.b32.xlu1 %v3251_v18, %s3097_s1 }
 0x577   :  { %641 = vrot.lane.b32.xlu1 %v3251_v18, %s3098_s22 }
 0x57b   :  { %719 = vrot.lane.b32.xlu1 %v3253_v21, %s3098_s22 }
 0x57c   :  { %564 = vrot.lane.b32.xlu0 %v3253_v21, %s3096_s21 }
 0x580   :  { %721 = vrot.lane.b32.xlu0 %v3253_v21, %s3097_s1 }
 0x5ef   :  { %v480_v48 = vpop.xlane.xlu1 %479 }
 0x5f0   :  { %3014 = vrcp.f32 %v480_v48 }
 0x5f3   :  { %v483_v49 = vpop.xlane.xlu0 %482  ;;  %v644_v54 = vpop.permute.xlu1 %643 }
 0x5f4   :  { %3016 = vrcp.f32 %v483_v49 }
 0x5f7   :  { %v565_v52 = vpop.permute.xlu0 %564  ;;  %v642_v56 = vpop.permute.xlu1 %641 }
 0x5fa   :  { %v3015_v50 = vpop.eup %3014 }
 0x5fb   :  { %v486_v51 = vmul.f32 %v3015_v50, %v3011_v44  ;;  %v722_v57 = vpop.permute.xlu0 %721  ;;  %v720_v58 = vpop.permute.xlu1 %719 }
 0x5fd   :  { %2783 = vmatmul.mubr.msk.f32.vlgmr.msra.gmra.mrb[8].mxu1 %vm465_vm9, %v486_v51 }
 0x5fe   :  { %v3017_v53 = vpop.eup %3016  ;;  %2786 = vmatpush3.msra.mxu1 %v565_v52  ;;  %2787 = vmatprep.mubr.msk.f32.mxu1 %vm3094_vm7, %v3093_v61 }
 0x5ff   :  { %v487_v55 = vmul.f32 %v3017_v53, %v3013_v46  ;;  %2790 = vmatprep.subr.mxu1 %v3093_v61 }
 0x601   :  { %2788 = vmatmul.mubr.msk.f32.vlgmr.msra.gmra.mrb[10].mxu1 %vm465_vm9, %v487_v55 }
 0x602   :  { %2792 = vmatprep.mubr.msk.f32.mxu1 %vm3094_vm7, %v3093_v61 }
 0x605   :  { %2791 = vmatpush3.xpose.msk.msra.mxu1 %vm297_vm8, %v644_v54 }
 0x606   :  { %2795 = vmatprep.subr.mxu1 %v3093_v61 }
 0x608   :  { %2793 = vmatmul.mubr.msk.f32.vlgmr.msra.gmra.mrb[12].mxu1 %vm297_vm8, %v642_v56 }
 0x609   :  { %2796 = vmatpush3.xpose.msk.msra.mxu1 %vm297_vm8, %v722_v57  ;;  %2797 = vmatprep.mubr.msk.f32.mxu1 %vm3094_vm7, %v3093_v61 }
 0x60a   :  { %2800 = vmatprep.subr.mxu1 %v3093_v61 }
 0x60c   :  { %2798 = vmatmul.mubr.msk.f32.vlgmr.msra.gmra.mrb[14].mxu1 %vm297_vm8, %v720_v58 }
 0x60d   :  { %2802 = vmatprep.mubr.msk.f32.mxu1 %vm3094_vm7, %v3093_v61 }
 0x6d0   :  { %v560_v59 = vpop.f32.mrb[8].mxu1 }
 0x6d1   :  { %v2784_v60 = vpop.f32.mrb[9].mxu1 }
 0x6d4   :  { %v636_v62 = vpop.f32.mrb[10].mxu1 }
 0x6d5   :  { %v640_v63 = vpack.c.bf16 %v636_v62, %v560_v59  ;;  %v2789_v0 = vpop.f32.mrb[11].mxu1 }
 0x6db   :  { %v715_v1 = vpop.f32.mrb[12].mxu1 }
 0x6dc   :  { %v797_v2 = vmul.f32 0.25, %v715_v1  ;;  %v2794_v3 = vpop.f32.mrb[13].mxu1 }
 0x6dd   :  { %v2991_v3 = vld [vmem:[%s3611_s6 + $0x8] sm:$0xff]  }
 0x6de   :  { %v799_v4 = vadd.f32 %v3274_v26, %v797_v2 }
 0x6df   :  { %v793_v5 = vpop.f32.mrb[14].mxu1 }
 0x6e0   :  { %v798_v6 = vmul.f32 0.25, %v793_v5  ;;  %v2799_v7 = vpop.f32.mrb[15].mxu1  ;;  %v801_v8 = vsel %vm465_vm9, %v799_v4, -inf }
 0x6e1   :  { %802 = vmax.xlane.f32.xlu0 %v801_v8 }
 0x6e2   :  { %v800_v9 = vadd.f32 %v3280_v31, %v798_v6 }
 0x6e4   :  { %v804_v10 = vsel %vm465_vm9, %v800_v9, -inf }
 0x6e5   :  { %805 = vmax.xlane.f32.xlu1 %v804_v10 }
 0x6f6   :  { %823 = vrot.lane.b32.xlu1 %v3251_v18, %s3099_s23 }
 0x76e   :  { %v803_v11 = vpop.xlane.xlu0 %802 }
 0x76f   :  { %v807_v12 = vsub.f32 %v799_v4, %v803_v11  ;;  %v2571_v11 = vld [vmem:[%s3608_s3 + $0x5] ss:$0 sm:$0xff] }
 0x771   :  { %v809_v15 = vmul.f32 1.442695, %v807_v12 }
 0x772   :  { %v806_v16 = vpop.xlane.xlu1 %805 }
 0x773   :  { %3018 = vpow2.f32 %v809_v15  ;;  %v808_v17 = vsub.f32 %v800_v9, %v806_v16 }
 0x775   :  { %v811_v19 = vmul.f32 1.442695, %v808_v17 }
 0x776   :  { %v824_v20 = vpop.permute.xlu1 %823 }
 0x777   :  { %3020 = vpow2.f32 %v811_v19  ;;  %2801 = vmatpush3.msra.mxu1 %v824_v20  ;;  %v2572_v19 = vld [vmem:[%s3608_s3 + $0x6] ss:$0 sm:$0xff] }
 0x778   :  { %2810 = vmatprep.subr.bf16.mxu1 %v3093_v61 }
 0x77d   :  { %v3019_v22 = vpop.eup %3018 }
 0x77e   :  { %v813_v23 = vsel %vm465_vm9, %v3019_v22, 0.0 }
 0x77f   :  { %814 = vadd.xlane.f32.xlu0 %v813_v23 }
 0x781   :  { %v3021_v24 = vpop.eup %3020 }
 0x782   :  { %v816_v25 = vsel %vm465_vm9, %v3021_v24, 0.0 }
 0x783   :  { %817 = vadd.xlane.f32.xlu0 %v816_v25  ;;  %v2992_v25 = vld [vmem:[%s3612_s7] sm:$0xff]  }
 0x799   :  { %899 = vrot.lane.b32.xlu0 %v3253_v21, %s3099_s23 }
 0x80c   :  { %v815_v18 = vpop.xlane.xlu0 %814 }
 0x80d   :  { %3022 = vrcp.f32 %v815_v18  ;;  %v2993_v18 = vld [vmem:[%s3612_s7 + $0x8] sm:$0xff]  }
 0x810   :  { %v818_v27 = vpop.xlane.xlu0 %817 }
 0x811   :  { %3024 = vrcp.f32 %v818_v27  ;;  %v2994_v27 = vld [vmem:[%s3612_s7 + $0x10] sm:$0xff]  }
 0x814   :  { %v900_v28 = vpop.permute.xlu0 %899 }
 0x815   :  { %2806 = vmatpush3.msra.mxu0 %v900_v28  ;;  %v2995_v28 = vld [vmem:[%s3612_s7 + $0x18] sm:$0xff]  }
 0x816   :  { %2816 = vmatprep.subr.bf16.mxu0 %v3093_v61 }
 0x817   :  { %v3023_v29 = vpop.eup %3022 }
 0x818   :  { %v821_v30 = vmul.f32 %v3023_v29, %v3019_v22  ;;  %v2573_v29 = vld [vmem:[%s3608_s3 + $0x7] ss:$0 sm:$0xff] }
 0x81a   :  { %2803 = vmatmul.mubr.msk.f32.vlgmr.msra.gmra.mrb[16].mxu1 %vm465_vm9, %v821_v30 }
 0x81b   :  { %v3025_v32 = vpop.eup %3024  ;;  %2812 = vmatprep.mubr.msk.bf16.mxu1 %vm3094_vm7, %v3093_v61  ;;  %2811 = vmatpush3.bf16.msra.mxu1 %v2989_v34 }
 0x81c   :  { %v822_v21 = vmul.f32 %v3025_v32, %v3021_v24  ;;  %2822 = vmatprep.subr.bf16.mxu1 %v3093_v61 }
 0x81e   :  { %2808 = vmatmul.mubr.msk.f32.vlgmr.msra.gmra.mrb[2].mxu0 %vm465_vm9, %v822_v21 }
 0x81f   :  { %2817 = vmatpush3.bf16.msra.mxu0 %v2988_v33  ;;  %2818 = vmatprep.mubr.msk.bf16.mxu0 %vm3094_vm7, %v3093_v61 }
 0x820   :  { %2830 = vmatprep.subr.bf16.mxu0 %v3093_v61 }
 0x822   :  { %2819 = vmatmul.mubr.msk.bf16.vlgmr.msra.gmra.mrb[4].mxu0 %vm297_vm8, %v640_v63 }
 0x823   :  { %2838 = vmatprep.mubr.msk.bf16.mxu0 %vm3094_vm7, %v3093_v61  ;;  %2831 = vmatpush3.bf16.msra.mxu0 %v2992_v25 }
 0x824   :  { %2832 = vmatprep.subr.bf16.mxu0 %v3093_v61 }
 0x827   :  { %2833 = vmatpush3.bf16.msra.mxu0 %v2993_v18 }
 0x828   :  { %2834 = vmatprep.subr.bf16.mxu0 %v3093_v61 }
 0x82b   :  { %2835 = vmatpush3.bf16.msra.mxu0 %v2994_v27 }
 0x82c   :  { %2836 = vmatprep.subr.bf16.mxu0 %v3093_v61 }
 0x82f   :  { %2837 = vmatpush3.bf16.msra.mxu0 %v2995_v28 }
 0x830   :  { %2855 = vmatprep.subr.mxu0 %v3093_v61 }
 0x8ed   :  { %v895_v35 = vpop.f32.mrb[16].mxu1 }
 0x8ee   :  { %v2804_v36 = vpop.f32.mrb[17].mxu1 }
 0x8f1   :  { %v971_v37 = vpop.f32.mrb[2].mxu0 }
 0x8f2   :  { %v975_v38 = vpack.c.bf16 %v971_v37, %v895_v35  ;;  %v2809_v39 = vpop.f32.mrb[3].mxu0 }
 0x8f4   :  { %2813 = vmatmul.mubr.msk.bf16.vlgmr.msra.gmra.mrb[20].mxu1 %vm297_vm8, %v975_v38 }
 0x8f5   :  { %v1069_v40 = vpop.f32.mrb[4].mxu0  ;;  %2826 = vmatprep.mubr.msk.bf16.mxu1 %vm3094_vm7, %v3093_v61 }
 0x8f6   :  { %v2820_v41 = vpop.f32.mrb[5].mxu0 }
 0x8f7   :  { %v1072_v42 = vpop.f32.mrb[6].mxu0 }
 0x8f8   :  { %v2821_v43 = vpop.f32.mrb[7].mxu0 }
 0x9c7   :  { %v1019_v44 = vpop.f32.mrb[20].mxu1 }
 0x9c8   :  { %v1070_v46 = vadd.f32 %v1069_v40, %v1019_v44  ;;  %v2814_v47 = vpop.f32.mrb[21].mxu1 }
 0x9c9   :  { %v1022_v48 = vpop.f32.mrb[22].mxu1 }
 0x9ca   :  { %v1081_v49 = vadd.f32 %v2570_v45, %v1070_v46  ;;  %v1073_v50 = vadd.f32 %v1072_v42, %v1022_v48  ;;  %v2815_v51 = vpop.f32.mrb[23].mxu1 }
 0x9cc   :  { %v1082_v52 = vadd.f32 %v2570_v45, %v1073_v50  ;;  %v1083_v53 = vadd.f32 %v1081_v49, %v3239_v13 }
 0x9ce   :  { %v1087_v54 = vsel %vm170_vm6, %v1083_v53, 0.0  ;;  %v1084_v55 = vadd.f32 %v1082_v52, %v3241_v14  ;;  %v2990_v14 = vld [vmem:[%s3611_s6] sm:$0xff]  }
 0x9cf   :  { %1088 = vadd.xlane.f32.xlu1 %v1087_v54  ;;  %2823 = vmatpush3.bf16.msra.mxu1 %v2990_v14 }
 0x9d0   :  { %v1090_v56 = vsel %vm170_vm6, %v1084_v55, 0.0  ;;  %2824 = vmatprep.subr.bf16.mxu1 %v3093_v61 }
 0x9d1   :  { %1091 = vadd.xlane.f32.xlu0 %v1090_v56 }
 0x9d3   :  { %2825 = vmatpush3.bf16.msra.mxu1 %v2991_v3 }
 0x9d4   :  { %2842 = vmatprep.subr.bf16.mxu1 %v3093_v61 }
 0xa5c   :  { %v1089_v57 = vpop.xlane.xlu1 %1088 }
 0xa5d   :  { %v1093_v58 = vmul.f32 0.03125, %v1089_v57 }
 0xa5e   :  { %v1092_v59 = vpop.xlane.xlu0 %1091 }
 0xa5f   :  { %v1095_v60 = vsub.f32 %v1083_v53, %v1093_v58  ;;  %v1094_v62 = vmul.f32 0.03125, %v1092_v59 }
 0xa61   :  { %v1096_v63 = vsub.f32 %v1084_v55, %v1094_v62  ;;  %v1097_v0 = vmul.f32 %v1095_v60, %v1095_v60  ;;  %v2577_v55 = vld [vmem:[%s3608_s3 + $0x8] ss:$0 sm:$0xff] }
 0xa63   :  { %v1099_v1 = vsel %vm170_vm6, %v1097_v0, 0.0  ;;  %v1098_v2 = vmul.f32 %v1096_v63, %v1096_v63 }
 0xa64   :  { %1100 = vadd.xlane.f32.xlu1 %v1099_v1 }
 0xa65   :  { %v1102_v13 = vsel %vm170_vm6, %v1098_v2, 0.0 }
 0xa66   :  { %1103 = vadd.xlane.f32.xlu0 %v1102_v13 }
 0xaf1   :  { %v1101_v4 = vpop.xlane.xlu1 %1100 }
 0xaf2   :  { %v1105_v5 = vmul.f32 0.03125, %v1101_v4 }
 0xaf3   :  { %v1104_v6 = vpop.xlane.xlu0 %1103 }
 0xaf4   :  { %v1107_v7 = vadd.f32 1e-12, %v1105_v5  ;;  %v1106_v8 = vmul.f32 0.03125, %v1104_v6 }
 0xaf6   :  { %3026 = vrsqrt.f32 %v1107_v7  ;;  %v1108_v9 = vadd.f32 1e-12, %v1106_v8 }
 0xaf8   :  { %3028 = vrsqrt.f32 %v1108_v9 }
 0xb00   :  { %v3027_v10 = vpop.eup %3026 }
 0xb01   :  { %v1111_v12 = vmul.f32 %v3027_v10, %v1095_v60 }
 0xb02   :  { %v3029_v15 = vpop.eup %3028 }
 0xb03   :  { %v1117_v16 = vmul.f32 %v2571_v11, %v1111_v12  ;;  %v1112_v17 = vmul.f32 %v3029_v15, %v1096_v63  ;;  %v2997_v12 = vld [vmem:[%s3609_s4 + $0x18] sm:$0xff]  }
 0xb05   :  { %v1118_v20 = vmul.f32 %v2571_v11, %v1112_v17  ;;  %v1123_v22 = vadd.f32 %v2572_v19, %v1117_v16  ;;  %v2996_v11 = vld [vmem:[%s3609_s4 + $0x10] sm:$0xff]  }
 0xb07   :  { %v1124_v23 = vadd.f32 %v2572_v19, %v1118_v20 }
 0xb09   :  { %v1125_v24 = vpack.c.bf16 %v1124_v23, %v1123_v22 }
 0xb0b   :  { %2827 = vmatmul.mubr.msk.bf16.vlgmr.msra.gmra.mrb[24].mxu1 %vm170_vm6, %v1125_v24  ;;  %v2583_v24 = vld [vmem:[%s3608_s3 + $0x9] ss:$0 sm:$0xff] }
 0xb0c   :  { %2846 = vmatprep.mubr.msk.bf16.mxu1 %vm3094_vm7, %v3093_v61  ;;  %2843 = vmatpush3.bf16.msra.mxu1 %v2996_v11 }
 0xb0d   :  { %2844 = vmatprep.subr.bf16.mxu1 %v3093_v61 }
 0xb10   :  { %2845 = vmatpush3.bf16.msra.mxu1 %v2997_v12 }
 0xb11   :  { %2850 = vmatprep.subr.mxu1 %v3093_v61 }
 0xbde   :  { %v1180_v30 = vpop.f32.mrb[24].mxu1 }
 0xbdf   :  { %v1181_v32 = vadd.f32 %v2573_v29, %v1180_v30  ;;  %v2828_v33 = vpop.f32.mrb[25].mxu1 }
 0xbe0   :  { %v1183_v21 = vpop.f32.mrb[26].mxu1 }
 0xbe1   :  { %v1187_v34 = vmul.f32 %v1181_v32, %v1181_v32  ;;  %v1184_v35 = vadd.f32 %v2573_v29, %v1183_v21  ;;  %v2829_v36 = vpop.f32.mrb[27].mxu1  ;;  %v2584_v29 = vld [vmem:[%s3608_s3 + $0xa] ss:$0 sm:$0xff] }
 0xbe3   :  { %v1189_v37 = vmul.f32 %v1187_v34, %v1181_v32  ;;  %v1188_v38 = vmul.f32 %v1184_v35, %v1184_v35  ;;  %v2605_v34 = vld [vmem:[%s3608_s3 + $0xb] ss:$0 sm:$0xff] }
 0xbe5   :  { %v1191_v39 = vmul.f32 0.044715, %v1189_v37  ;;  %v1190_v40 = vmul.f32 %v1188_v38, %v1184_v35 }
 0xbe7   :  { %v1193_v41 = vadd.f32 %v1191_v39, %v1181_v32  ;;  %v1192_v42 = vmul.f32 0.044715, %v1190_v40 }
 0xbe9   :  { %v1195_v43 = vmul.f32 0.7978846, %v1193_v41  ;;  %v1194_v44 = vadd.f32 %v1192_v42, %v1184_v35 }
 0xbeb   :  { %3030 = vtanh.f32 %v1195_v43  ;;  %v1196_v45 = vmul.f32 0.7978846, %v1194_v44 }
 0xbed   :  { %3032 = vtanh.f32 %v1196_v45 }
 0xbf5   :  { %v3031_v46 = vpop.eup %3030 }
 0xbf6   :  { %v1199_v47 = vadd.f32 1.0, %v3031_v46 }
 0xbf7   :  { %v3033_v48 = vpop.eup %3032 }
 0xbf8   :  { %v1201_v49 = vmul.f32 0.5, %v1199_v47  ;;  %v1200_v50 = vadd.f32 1.0, %v3033_v48 }
 0xbfa   :  { %v1202_v51 = vmul.f32 0.5, %v1200_v50  ;;  %v1203_v52 = vmul.f32 %v1201_v49, %v1181_v32 }
 0xbfc   :  { %v1204_v53 = vmul.f32 %v1202_v51, %v1184_v35 }
 0xbfe   :  { %v1205_v54 = vpack.c.bf16 %v1204_v53, %v1203_v52 }
 0xc00   :  { %2839 = vmatmul.mubr.msk.bf16.vlgmr.msra.gmra.mrb[8].mxu0 %vm1235_vm10, %v1205_v54 }
 0xc01   :  { %2857 = vmatprep.mubr.msk.f32.mxu0 %vm3094_vm7, %v3093_v61 }
 0xcd3   :  { %v1273_v56 = vpop.f32.mrb[8].mxu0 }
 0xcd4   :  { %v1274_v57 = vadd.f32 %v2577_v55, %v1273_v56  ;;  %v2840_v58 = vpop.f32.mrb[9].mxu0 }
 0xcd5   :  { %v1276_v59 = vpop.f32.mrb[10].mxu0 }
 0xcd6   :  { %v1277_v60 = vadd.f32 %v2577_v55, %v1276_v59  ;;  %v2841_v62 = vpop.f32.mrb[11].mxu0  ;;  %v1280_v63 = vadd.f32 %v1274_v57, %v1123_v22 }
 0xcd8   :  { %v1284_v0 = vsel %vm170_vm6, %v1280_v63, 0.0  ;;  %v1281_v1 = vadd.f32 %v1277_v60, %v1124_v23 }
 0xcd9   :  { %1285 = vadd.xlane.f32.xlu1 %v1284_v0 }
 0xcda   :  { %v1287_v2 = vsel %vm170_vm6, %v1281_v1, 0.0 }
 0xcdb   :  { %1288 = vadd.xlane.f32.xlu0 %v1287_v2 }
 0xd66   :  { %v1286_v13 = vpop.xlane.xlu1 %1285 }
 0xd67   :  { %v1290_v14 = vmul.f32 0.03125, %v1286_v13 }
 0xd68   :  { %v1289_v3 = vpop.xlane.xlu0 %1288 }
 0xd69   :  { %v1292_v4 = vsub.f32 %v1280_v63, %v1290_v14  ;;  %v1291_v5 = vmul.f32 0.03125, %v1289_v3 }
 0xd6b   :  { %v1293_v6 = vsub.f32 %v1281_v1, %v1291_v5  ;;  %v1294_v7 = vmul.f32 %v1292_v4, %v1292_v4 }
 0xd6d   :  { %v1296_v8 = vsel %vm170_vm6, %v1294_v7, 0.0  ;;  %v1295_v9 = vmul.f32 %v1293_v6, %v1293_v6 }
 0xd6e   :  { %1297 = vadd.xlane.f32.xlu1 %v1296_v8 }
 0xd6f   :  { %v1299_v10 = vsel %vm170_vm6, %v1295_v9, 0.0 }
 0xd70   :  { %1300 = vadd.xlane.f32.xlu0 %v1299_v10 }
 0xdfb   :  { %v1298_v15 = vpop.xlane.xlu1 %1297 }
 0xdfc   :  { %v1302_v16 = vmul.f32 0.03125, %v1298_v15 }
 0xdfd   :  { %v1301_v17 = vpop.xlane.xlu0 %1300 }
 0xdfe   :  { %v1304_v19 = vadd.f32 1e-12, %v1302_v16  ;;  %v1303_v20 = vmul.f32 0.03125, %v1301_v17 }
 0xe00   :  { %3034 = vrsqrt.f32 %v1304_v19  ;;  %v1305_v22 = vadd.f32 1e-12, %v1303_v20 }
 0xe02   :  { %3036 = vrsqrt.f32 %v1305_v22 }
 0xe0a   :  { %v3035_v23 = vpop.eup %3034 }
 0xe0b   :  { %v1308_v25 = vmul.f32 %v3035_v23, %v1292_v4 }
 0xe0c   :  { %v3037_v18 = vpop.eup %3036 }
 0xe0d   :  { %v1314_v27 = vmul.f32 %v2583_v24, %v1308_v25  ;;  %v1309_v28 = vmul.f32 %v3037_v18, %v1293_v6 }
 0xe0f   :  { %v1315_v30 = vmul.f32 %v2583_v24, %v1309_v28  ;;  %v3418_v32 = vadd.f32 %v2584_v29, %v1314_v27 }
 0xe11   :  { %v3420_v33 = vadd.f32 %v2584_v29, %v1315_v30 }
 0xe13   :  { %v1346_v21 = vpack.c.bf16 %v3420_v33, %v3418_v32 }
 0xe15   :  { %2847 = vmatmul.mubr.msk.bf16.vlgmr.msra.gmra.mrb[28].mxu1 %vm170_vm6, %v1346_v21 }
 0xe16   :  { %2852 = vmatprep.mubr.msk.f32.mxu1 %vm3094_vm7, %v3093_v61 }
 0xee8   :  { %v1401_v35 = vpop.f32.mrb[28].mxu1 }
 0xee9   :  { %v3430_v36 = vadd.f32 %v2605_v34, %v1401_v35  ;;  %v2848_v37 = vpop.f32.mrb[29].mxu1 }
 0xeea   :  { %v1404_v38 = vpop.f32.mrb[30].mxu1 }
 0xeeb   :  { %v3432_v39 = vadd.f32 %v2605_v34, %v1404_v38  ;;  %1409 = vrot.lane.b32.xlu1 %v3430_v36, %s3095_s16  ;;  %v2849_v40 = vpop.f32.mrb[31].mxu1 }
 0xeed   :  { %1486 = vrot.lane.b32.xlu0 %v3432_v39, %s3095_s16 }
 0xf5d   :  { %v1410_v41 = vpop.permute.xlu1 %1409 }
 0xf5e   :  { %2851 = vmatpush3.xpose.msk.msra.mxu1 %vm297_vm8, %v1410_v41 }
 0xf5f   :  { %v1487_v42 = vpop.permute.xlu0 %1486  ;;  %2860 = vmatprep.subr.mxu1 %v3093_v61 }
 0xf60   :  { %2856 = vmatpush3.xpose.msk.msra.mxu0 %vm297_vm8, %v1487_v42 }
 0xf61   :  { %2853 = vmatmul.mubr.msk.f32.vlgmr.msra.gmra.mrb[18].mxu1 %vm297_vm8, %v3430_v36  ;;  %2865 = vmatprep.subr.mxu0 %v3093_v61 }
 0xf62   :  { %2862 = vmatprep.mubr.msk.f32.mxu1 %vm3094_vm7, %v3093_v61 }
 0xf63   :  { %2858 = vmatmul.mubr.msk.f32.vlgmr.msra.gmra.mrb[12].mxu0 %vm297_vm8, %v3432_v39 }
 0xf64   :  { %2867 = vmatprep.mubr.msk.f32.mxu0 %vm3094_vm7, %v3093_v61 }
0x1034   :  { %v1481_v43 = vpop.f32.mrb[18].mxu1 }
0x1035   :  { %v1562_v44 = vmul.f32 0.25, %v1481_v43  ;;  %v2854_v45 = vpop.f32.mrb[19].mxu1 }
0x1036   :  { %v1558_v46 = vpop.f32.mrb[12].mxu0 }
0x1037   :  { %v1563_v47 = vmul.f32 0.25, %v1558_v46  ;;  %v2859_v48 = vpop.f32.mrb[13].mxu0  ;;  %v1564_v49 = vadd.f32 %v3274_v26, %v1562_v44 }
0x1038   :  { %v2999_v48 = vld [vmem:[%s3610_s5 + $0x18] sm:$0xff]  }
0x1039   :  { %v1566_v50 = vsel %vm465_vm9, %v1564_v49, -inf  ;;  %v1565_v51 = vadd.f32 %v3280_v31, %v1563_v47  ;;  %v2998_v47 = vld [vmem:[%s3610_s5 + $0x10] sm:$0xff]  }
0x103a   :  { %1567 = vmax.xlane.f32.xlu1 %v1566_v50 }
0x103b   :  { %v1569_v52 = vsel %vm465_vm9, %v1565_v51, -inf }
0x103c   :  { %1570 = vmax.xlane.f32.xlu0 %v1569_v52 }
0x104b   :  { %1588 = vrot.lane.b32.xlu1 %v3430_v36, %s3096_s21 }
0x104f   :  { %1743 = vrot.lane.b32.xlu1 %v3430_v36, %s3097_s1 }
0x1052   :  { %1664 = vrot.lane.b32.xlu0 %v3432_v39, %s3096_s21 }
0x1053   :  { %1821 = vrot.lane.b32.xlu1 %v3432_v39, %s3097_s1 }
0x10c7   :  { %v1568_v53 = vpop.xlane.xlu1 %1567 }
0x10c8   :  { %v1572_v54 = vsub.f32 %v1564_v49, %v1568_v53 }
0x10c9   :  { %v1571_v55 = vpop.xlane.xlu0 %1570 }
0x10ca   :  { %v1574_v56 = vmul.f32 1.442695, %v1572_v54  ;;  %v1573_v57 = vsub.f32 %v1565_v51, %v1571_v55 }
0x10cb   :  { %v1589_v58 = vpop.permute.xlu1 %1588 }
0x10cc   :  { %3038 = vpow2.f32 %v1574_v56  ;;  %v1576_v59 = vmul.f32 1.442695, %v1573_v57  ;;  %2861 = vmatpush3.msra.mxu1 %v1589_v58 }
0x10cd   :  { %v1665_v60 = vpop.permute.xlu0 %1664  ;;  %2870 = vmatprep.subr.mxu1 %v3093_v61 }
0x10ce   :  { %3040 = vpow2.f32 %v1576_v59  ;;  %2866 = vmatpush3.msra.mxu0 %v1665_v60  ;;  %v2625_v59 = vld [vmem:[%s3608_s3 + $0xc] ss:$0 sm:$0xff] }
0x10cf   :  { %2875 = vmatprep.subr.mxu0 %v3093_v61  ;;  %v1744_v2 = vpop.permute.xlu1 %1743 }
0x10d3   :  { %v1822_v13 = vpop.permute.xlu1 %1821 }
0x10d6   :  { %v3039_v62 = vpop.eup %3038 }
0x10d7   :  { %v1578_v63 = vsel %vm465_vm9, %v3039_v62, 0.0 }
0x10d8   :  { %v3041_v0 = vpop.eup %3040  ;;  %1579 = vadd.xlane.f32.xlu1 %v1578_v63 }
0x10d9   :  { %v1581_v1 = vsel %vm465_vm9, %v3041_v0, 0.0 }
0x10da   :  { %1582 = vadd.xlane.f32.xlu0 %v1581_v1 }
0x10e9   :  { %1819 = vrot.lane.b32.xlu1 %v3432_v39, %s3098_s22 }
0x10f0   :  { %1741 = vrot.lane.b32.xlu0 %v3430_v36, %s3098_s22 }
0x1165   :  { %v1580_v14 = vpop.xlane.xlu1 %1579 }
0x1166   :  { %3042 = vrcp.f32 %v1580_v14 }
0x1167   :  { %v1583_v3 = vpop.xlane.xlu0 %1582 }
0x1168   :  { %3044 = vrcp.f32 %v1583_v3 }
0x1169   :  { %v1820_v9 = vpop.permute.xlu1 %1819 }
0x116b   :  { %v1742_v8 = vpop.permute.xlu0 %1741 }
0x1170   :  { %v3043_v4 = vpop.eup %3042 }
0x1171   :  { %v1586_v5 = vmul.f32 %v3043_v4, %v3039_v62 }
0x1172   :  { %v3045_v6 = vpop.eup %3044 }
0x1173   :  { %v1587_v7 = vmul.f32 %v3045_v6, %v3041_v0  ;;  %2863 = vmatmul.mubr.msk.f32.vlgmr.msra.gmra.mrb[32].mxu1 %vm465_vm9, %v1586_v5 }
0x1174   :  { %2871 = vmatpush3.xpose.msk.msra.mxu1 %vm297_vm8, %v1744_v2  ;;  %2872 = vmatprep.mubr.msk.f32.mxu1 %vm3094_vm7, %v3093_v61 }
0x1175   :  { %2868 = vmatmul.mubr.msk.f32.vlgmr.msra.gmra.mrb[14].mxu0 %vm465_vm9, %v1587_v7  ;;  %2880 = vmatprep.subr.mxu1 %v3093_v61 }
0x1176   :  { %2876 = vmatpush3.xpose.msk.msra.mxu0 %vm297_vm8, %v1822_v13  ;;  %2877 = vmatprep.mubr.msk.f32.mxu0 %vm3094_vm7, %v3093_v61 }
0x1177   :  { %2873 = vmatmul.mubr.msk.f32.vlgmr.msra.gmra.mrb[34].mxu1 %vm297_vm8, %v1742_v8  ;;  %2885 = vmatprep.subr.mxu0 %v3093_v61 }
0x1178   :  { %2882 = vmatprep.mubr.msk.f32.mxu1 %vm3094_vm7, %v3093_v61 }
0x1179   :  { %2878 = vmatmul.mubr.msk.f32.vlgmr.msra.gmra.mrb[16].mxu0 %vm297_vm8, %v1820_v9 }
0x117a   :  { %2887 = vmatprep.mubr.msk.f32.mxu0 %vm3094_vm7, %v3093_v61 }
0x1246   :  { %v1660_v10 = vpop.f32.mrb[32].mxu1 }
0x1247   :  { %v2864_v11 = vpop.f32.mrb[33].mxu1 }
0x1248   :  { %v1736_v12 = vpop.f32.mrb[14].mxu0 }
0x1249   :  { %v1740_v15 = vpack.c.bf16 %v1736_v12, %v1660_v10  ;;  %v2869_v16 = vpop.f32.mrb[15].mxu0 }
0x124a   :  { %v1815_v17 = vpop.f32.mrb[34].mxu1 }
0x124b   :  { %v1897_v19 = vmul.f32 0.25, %v1815_v17  ;;  %v2874_v20 = vpop.f32.mrb[35].mxu1  ;;  %v3001_v17 = vld [vmem:[%s3611_s6 + $0x18] sm:$0xff]  }
0x124c   :  { %v1893_v22 = vpop.f32.mrb[16].mxu0 }
0x124d   :  { %v1898_v23 = vmul.f32 0.25, %v1893_v22  ;;  %v2879_v24 = vpop.f32.mrb[17].mxu0  ;;  %v1899_v25 = vadd.f32 %v3274_v26, %v1897_v19 }
0x124f   :  { %v1901_v18 = vsel %vm465_vm9, %v1899_v25, -inf  ;;  %v1900_v27 = vadd.f32 %v3280_v31, %v1898_v23 }
0x1250   :  { %1902 = vmax.xlane.f32.xlu0 %v1901_v18 }
0x1251   :  { %v1904_v28 = vsel %vm465_vm9, %v1900_v27, -inf }
0x1252   :  { %1905 = vmax.xlane.f32.xlu1 %v1904_v28 }
0x1263   :  { %1923 = vrot.lane.b32.xlu1 %v3430_v36, %s3099_s23 }
0x12dd   :  { %v1903_v29 = vpop.xlane.xlu0 %1902 }
0x12de   :  { %v1907_v30 = vsub.f32 %v1899_v25, %v1903_v29 }
0x12df   :  { %v1906_v21 = vpop.xlane.xlu1 %1905 }
0x12e0   :  { %v1909_v34 = vmul.f32 1.442695, %v1907_v30  ;;  %v1908_v35 = vsub.f32 %v1900_v27, %v1906_v21  ;;  %v2626_v27 = vld [vmem:[%s3608_s3 + $0xd] ss:$0 sm:$0xff] }
0x12e2   :  { %3046 = vpow2.f32 %v1909_v34  ;;  %v1911_v37 = vmul.f32 1.442695, %v1908_v35  ;;  %v2627_v34 = vld [vmem:[%s3608_s3 + $0xe] ss:$0 sm:$0xff] }
0x12e3   :  { %v1924_v38 = vpop.permute.xlu1 %1923 }
0x12e4   :  { %3048 = vpow2.f32 %v1911_v37  ;;  %2881 = vmatpush3.msra.mxu1 %v1924_v38 }
0x12e5   :  { %2890 = vmatprep.subr.bf16.mxu1 %v3093_v61 }
0x12ec   :  { %v3047_v26 = vpop.eup %3046 }
0x12ed   :  { %v1913_v31 = vsel %vm465_vm9, %v3047_v26, 0.0 }
0x12ee   :  { %v3049_v40 = vpop.eup %3048  ;;  %1914 = vadd.xlane.f32.xlu0 %v1913_v31  ;;  %v3002_v31 = vld [vmem:[%s3612_s7 + $0x20] sm:$0xff]  }
0x12ef   :  { %v1916_v41 = vsel %vm465_vm9, %v3049_v40, 0.0 }
0x12f2   :  { %1917 = vadd.xlane.f32.xlu0 %v1916_v41  ;;  %v3004_v41 = vld [vmem:[%s3612_s7 + $0x30] sm:$0xff]  }
0x1308   :  { %1999 = vrot.lane.b32.xlu0 %v3432_v39, %s3099_s23 }
0x137b   :  { %v1915_v36 = vpop.xlane.xlu0 %1914 }
0x137c   :  { %3050 = vrcp.f32 %v1915_v36  ;;  %v3005_v36 = vld [vmem:[%s3612_s7 + $0x38] sm:$0xff]  }
0x137f   :  { %v1918_v42 = vpop.xlane.xlu0 %1917 }
0x1380   :  { %3052 = vrcp.f32 %v1918_v42  ;;  %v2628_v42 = vld [vmem:[%s3608_s3 + $0xf] ss:$0 sm:$0xff] }
0x1383   :  { %v2000_v43 = vpop.permute.xlu0 %1999 }
0x1384   :  { %2886 = vmatpush3.msra.mxu0 %v2000_v43 }
0x1385   :  { %2896 = vmatprep.subr.bf16.mxu0 %v3093_v61 }
0x1386   :  { %v3051_v44 = vpop.eup %3050 }
0x1387   :  { %v1921_v45 = vmul.f32 %v3051_v44, %v3047_v26 }
0x1389   :  { %2883 = vmatmul.mubr.msk.f32.vlgmr.msra.gmra.mrb[36].mxu1 %vm465_vm9, %v1921_v45 }
0x138a   :  { %v3053_v46 = vpop.eup %3052  ;;  %2892 = vmatprep.mubr.msk.bf16.mxu1 %vm3094_vm7, %v3093_v61  ;;  %2891 = vmatpush3.bf16.msra.mxu1 %v2999_v48 }
0x138b   :  { %v1922_v39 = vmul.f32 %v3053_v46, %v3049_v40  ;;  %2902 = vmatprep.subr.bf16.mxu1 %v3093_v61  ;;  %v3003_v40 = vld [vmem:[%s3612_s7 + $0x28] sm:$0xff]  }
0x138d   :  { %2888 = vmatmul.mubr.msk.f32.vlgmr.msra.gmra.mrb[18].mxu0 %vm465_vm9, %v1922_v39 }
0x138e   :  { %2897 = vmatpush3.bf16.msra.mxu0 %v2998_v47  ;;  %2898 = vmatprep.mubr.msk.bf16.mxu0 %vm3094_vm7, %v3093_v61 }
0x138f   :  { %2910 = vmatprep.subr.bf16.mxu0 %v3093_v61 }
0x1391   :  { %2899 = vmatmul.mubr.msk.bf16.vlgmr.msra.gmra.mrb[20].mxu0 %vm297_vm8, %v1740_v15 }
0x1392   :  { %2918 = vmatprep.mubr.msk.bf16.mxu0 %vm3094_vm7, %v3093_v61  ;;  %2911 = vmatpush3.bf16.msra.mxu0 %v3002_v31 }
0x1393   :  { %2912 = vmatprep.subr.bf16.mxu0 %v3093_v61 }
0x1396   :  { %2913 = vmatpush3.bf16.msra.mxu0 %v3003_v40  ;;  %v2638_v40 = vld [vmem:[%s3608_s3 + $0x11] ss:$0 sm:$0xff] }
0x1397   :  { %2914 = vmatprep.subr.bf16.mxu0 %v3093_v61 }
0x139a   :  { %2915 = vmatpush3.bf16.msra.mxu0 %v3004_v41 }
0x139b   :  { %2916 = vmatprep.subr.bf16.mxu0 %v3093_v61 }
0x139e   :  { %2917 = vmatpush3.bf16.msra.mxu0 %v3005_v36 }
0x145c   :  { %v1995_v49 = vpop.f32.mrb[36].mxu1 }
0x145d   :  { %v2884_v50 = vpop.f32.mrb[37].mxu1 }
0x1460   :  { %v2071_v51 = vpop.f32.mrb[18].mxu0 }
0x1461   :  { %v2075_v52 = vpack.c.bf16 %v2071_v51, %v1995_v49  ;;  %v2889_v53 = vpop.f32.mrb[19].mxu0 }
0x1463   :  { %2893 = vmatmul.mubr.msk.bf16.vlgmr.msra.gmra.mrb[40].mxu1 %vm297_vm8, %v2075_v52 }
0x1464   :  { %v2169_v54 = vpop.f32.mrb[20].mxu0  ;;  %2906 = vmatprep.mubr.msk.bf16.mxu1 %vm3094_vm7, %v3093_v61 }
0x1465   :  { %v2900_v55 = vpop.f32.mrb[21].mxu0 }
0x1466   :  { %v2172_v56 = vpop.f32.mrb[22].mxu0 }
0x1467   :  { %v2901_v57 = vpop.f32.mrb[23].mxu0 }
0x1536   :  { %v2119_v58 = vpop.f32.mrb[40].mxu1 }
0x1537   :  { %v2170_v60 = vadd.f32 %v2169_v54, %v2119_v58  ;;  %v2894_v62 = vpop.f32.mrb[41].mxu1 }
0x1538   :  { %v2122_v63 = vpop.f32.mrb[42].mxu1 }
0x1539   :  { %v2181_v0 = vadd.f32 %v2625_v59, %v2170_v60  ;;  %v2173_v1 = vadd.f32 %v2172_v56, %v2122_v63  ;;  %v2895_v2 = vpop.f32.mrb[43].mxu1 }
0x153b   :  { %v2182_v13 = vadd.f32 %v2625_v59, %v2173_v1  ;;  %v2183_v14 = vadd.f32 %v2181_v0, %v3418_v32 }
0x153d   :  { %v2187_v3 = vsel %vm170_vm6, %v2183_v14, 0.0  ;;  %v2184_v4 = vadd.f32 %v2182_v13, %v3420_v33  ;;  %v3000_v33 = vld [vmem:[%s3611_s6 + $0x10] sm:$0xff]   ;;  %s2532_s6 = sshll.u32 %s3101_s26, 4  ;;  %s2533_s6 = int_to_ptr.vmem [resolvable:$true] %s2532_s6 }
0x153e   :  { %2188 = vadd.xlane.f32.xlu1 %v2187_v3  ;;  %2903 = vmatpush3.bf16.msra.mxu1 %v3000_v33  ;;  %v2632_v13 = vld [vmem:[%s3608_s3 + $0x10] ss:$0 sm:$0xff]  ;;  %s3066_s27 = scalar_lea.vmem %s2533_s6, 32  ;;  %p3071_p1 = scmp.lt.s32.totalorder %s2533_s6, %s2533_s6 }
0x153f   :  { %v2190_v5 = vsel %vm170_vm6, %v2184_v4, 0.0  ;;  %2904 = vmatprep.subr.bf16.mxu1 %v3093_v61  ;;  %p3067_p0 = scmp.ne.s32.totalorder %s2533_s6, %s3066_s27  ;;  %p3072_p2 = scmp.lt.s32.totalorder %s3066_s27, %s3066_s27 }
0x1540   :  { %2191 = vadd.xlane.f32.xlu0 %v2190_v5 }
0x1541   :  { %p3073_p3 = por %p3072_p2, %p3071_p1 }
0x1542   :  { %2905 = vmatpush3.bf16.msra.mxu1 %v3001_v17 }
0x1543   :  { %p3074_p4 = pnand %p3073_p3, %p3067_p0 }
0x15cb   :  { %v2189_v6 = vpop.xlane.xlu1 %2188 }
0x15cc   :  { %v2193_v7 = vmul.f32 0.03125, %v2189_v6 }
0x15cd   :  { %v2192_v8 = vpop.xlane.xlu0 %2191 }
0x15ce   :  { %v2195_v9 = vsub.f32 %v2183_v14, %v2193_v7  ;;  %v2194_v10 = vmul.f32 0.03125, %v2192_v8 }
0x15d0   :  { %v2196_v11 = vsub.f32 %v2184_v4, %v2194_v10  ;;  %v2197_v12 = vmul.f32 %v2195_v9, %v2195_v9 }
0x15d2   :  { %v2199_v15 = vsel %vm170_vm6, %v2197_v12, 0.0  ;;  %v2198_v16 = vmul.f32 %v2196_v11, %v2196_v11 }
0x15d3   :  { %2200 = vadd.xlane.f32.xlu1 %v2199_v15 }
0x15d4   :  { %v2202_v32 = vsel %vm170_vm6, %v2198_v16, 0.0 }
0x15d5   :  { %2203 = vadd.xlane.f32.xlu0 %v2202_v32 }
0x1660   :  { %v2201_v19 = vpop.xlane.xlu1 %2200 }
0x1661   :  { %v2205_v20 = vmul.f32 0.03125, %v2201_v19 }
0x1662   :  { %v2204_v22 = vpop.xlane.xlu0 %2203 }
0x1663   :  { %v2207_v23 = vadd.f32 1e-12, %v2205_v20  ;;  %v2206_v24 = vmul.f32 0.03125, %v2204_v22 }
0x1665   :  { %3054 = vrsqrt.f32 %v2207_v23  ;;  %v2208_v25 = vadd.f32 1e-12, %v2206_v24  ;;  %v2439_v24 = vld [vmem:[%s3613_s8] sm:$0xff] }
0x1667   :  { %3056 = vrsqrt.f32 %v2208_v25  ;;  %v2440_v25 = vld [vmem:[%s3613_s8 + $0x8] sm:$0xff] }
0x166f   :  { %v3055_v18 = vpop.eup %3054 }
0x1670   :  { %v2211_v28 = vmul.f32 %v3055_v18, %v2195_v9  ;;  %v2441_v18 = vld [vmem:[%s3613_s8 + $0x10] sm:$0xff] }
0x1671   :  { %v3057_v29 = vpop.eup %3056 }
0x1672   :  { %v2217_v30 = vmul.f32 %v2626_v27, %v2211_v28  ;;  %v2212_v21 = vmul.f32 %v3057_v29, %v2196_v11  ;;  %v2966_v28 = vpack.c.bf16 %v2440_v25, %v2439_v24  ;;  %v2442_v29 = vld [vmem:[%s3613_s8 + $0x18] sm:$0xff] }
0x1674   :  { %v2218_v35 = vmul.f32 %v2626_v27, %v2212_v21  ;;  %v2223_v37 = vadd.f32 %v2627_v34, %v2217_v30  ;;  %v3100_v27 = vmov 0.0|0.0   ;;  %v2969_v30 = vpack.c.bf16 %v2442_v29, %v2441_v18 }
0x1675   :  { %2965 = vmatprep.subr.bf16.mxu1 %v3100_v27 }
0x1676   :  { %v2224_v38 = vadd.f32 %v2627_v34, %v2218_v35 }
0x1678   :  { %v2225_v26 = vpack.c.bf16 %v2224_v38, %v2223_v37 }
0x167a   :  { %2907 = vmatmul.mubr.msk.bf16.vlgmr.msra.gmra.mrb[44].mxu1 %vm170_vm6, %v2225_v26 }
0x167b   :  { %2930 = vmatprep.mubr.msk.f32.mxu1 %vm3094_vm7, %v3093_v61  ;;  %2967 = vmatpush3.bf16.msra.mxu1 %v2966_v28 }
0x167c   :  { %2968 = vmatprep.subr.bf16.mxu1 %v3100_v27 }
0x167f   :  { %2970 = vmatpush3.bf16.msra.mxu1 %v2969_v30 }
0x174d   :  { %v2280_v43 = vpop.f32.mrb[44].mxu1 }
0x174e   :  { %v2281_v44 = vadd.f32 %v2628_v42, %v2280_v43  ;;  %v2908_v45 = vpop.f32.mrb[45].mxu1 }
0x174f   :  { %v2283_v46 = vpop.f32.mrb[46].mxu1 }
0x1750   :  { %v2287_v47 = vmul.f32 %v2281_v44, %v2281_v44  ;;  %v2284_v39 = vadd.f32 %v2628_v42, %v2283_v46  ;;  %v2909_v48 = vpop.f32.mrb[47].mxu1  ;;  %v2639_v42 = vld [vmem:[%s3608_s3 + $0x12] ss:$0 sm:$0xff] }
0x1752   :  { %v2289_v49 = vmul.f32 %v2287_v47, %v2281_v44  ;;  %v2288_v50 = vmul.f32 %v2284_v39, %v2284_v39 }
0x1754   :  { %v2291_v51 = vmul.f32 0.044715, %v2289_v49  ;;  %v2290_v61 = vmul.f32 %v2288_v50, %v2284_v39 }
0x1756   :  { %v2293_v52 = vadd.f32 %v2291_v51, %v2281_v44  ;;  %v2292_v53 = vmul.f32 0.044715, %v2290_v61 }
0x1758   :  { %v2295_v54 = vmul.f32 0.7978846, %v2293_v52  ;;  %v2294_v55 = vadd.f32 %v2292_v53, %v2284_v39 }
0x175a   :  { %3058 = vtanh.f32 %v2295_v54  ;;  %v2296_v56 = vmul.f32 0.7978846, %v2294_v55 }
0x175c   :  { %3060 = vtanh.f32 %v2296_v56 }
0x1764   :  { %v3059_v57 = vpop.eup %3058 }
0x1765   :  { %v2299_v58 = vadd.f32 1.0, %v3059_v57 }
0x1766   :  { %v3061_v59 = vpop.eup %3060 }
0x1767   :  { %v2301_v60 = vmul.f32 0.5, %v2299_v58  ;;  %v2300_v62 = vadd.f32 1.0, %v3061_v59 }
0x1769   :  { %v2302_v63 = vmul.f32 0.5, %v2300_v62  ;;  %v2303_v0 = vmul.f32 %v2301_v60, %v2281_v44 }
0x176b   :  { %v2304_v1 = vmul.f32 %v2302_v63, %v2284_v39 }
0x176d   :  { %v2305_v2 = vpack.c.bf16 %v2304_v1, %v2303_v0 }
0x176f   :  { %2919 = vmatmul.mubr.msk.bf16.vlgmr.msra.gmra.mrb[24].mxu0 %vm1235_vm10, %v2305_v2 }
0x1842   :  { %v2372_v14 = vpop.f32.mrb[24].mxu0 }
0x1843   :  { %v2373_v3 = vadd.f32 %v2632_v13, %v2372_v14  ;;  %v2920_v4 = vpop.f32.mrb[25].mxu0 }
0x1844   :  { %v2375_v5 = vpop.f32.mrb[26].mxu0 }
0x1845   :  { %v2376_v6 = vadd.f32 %v2632_v13, %v2375_v5  ;;  %v2921_v7 = vpop.f32.mrb[27].mxu0  ;;  %v2379_v8 = vadd.f32 %v2373_v3, %v2223_v37  ;;  %v2640_v13 = vld [vmem:[%s3608_s3 + $0x2] ss:$0 sm:$0xff] }
0x1847   :  { %v2383_v9 = vsel %vm170_vm6, %v2379_v8, 0.0  ;;  %v2380_v10 = vadd.f32 %v2376_v6, %v2224_v38 }
0x1848   :  { %2384 = vadd.xlane.f32.xlu0 %v2383_v9 }
0x1849   :  { %v2386_v11 = vsel %vm170_vm6, %v2380_v10, 0.0 }
0x184a   :  { %2387 = vadd.xlane.f32.xlu1 %v2386_v11 }
0x18d5   :  { %v2385_v12 = vpop.xlane.xlu0 %2384 }
0x18d6   :  { %v2389_v15 = vmul.f32 0.03125, %v2385_v12 }
0x18d7   :  { %v2388_v16 = vpop.xlane.xlu1 %2387 }
0x18d8   :  { %v2391_v32 = vsub.f32 %v2379_v8, %v2389_v15  ;;  %v2390_v33 = vmul.f32 0.03125, %v2388_v16 }
0x18da   :  { %v2392_v17 = vsub.f32 %v2380_v10, %v2390_v33  ;;  %v2393_v19 = vmul.f32 %v2391_v32, %v2391_v32 }
0x18dc   :  { %v2395_v20 = vsel %vm170_vm6, %v2393_v19, 0.0  ;;  %v2394_v22 = vmul.f32 %v2392_v17, %v2392_v17 }
0x18dd   :  { %2396 = vadd.xlane.f32.xlu0 %v2395_v20 }
0x18de   :  { %v2398_v23 = vsel %vm170_vm6, %v2394_v22, 0.0 }
0x18df   :  { %2399 = vadd.xlane.f32.xlu1 %v2398_v23 }
0x196a   :  { %v2397_v21 = vpop.xlane.xlu0 %2396 }
0x196b   :  { %v2401_v34 = vmul.f32 0.03125, %v2397_v21 }
0x196c   :  { %v2400_v35 = vpop.xlane.xlu1 %2399 }
0x196d   :  { %v2403_v37 = vadd.f32 1e-12, %v2401_v34  ;;  %v2402_v38 = vmul.f32 0.03125, %v2400_v35 }
0x196f   :  { %3062 = vrsqrt.f32 %v2403_v37  ;;  %v2404_v26 = vadd.f32 1e-12, %v2402_v38 }
0x1971   :  { %3064 = vrsqrt.f32 %v2404_v26 }
0x1979   :  { %v3063_v31 = vpop.eup %3062 }
0x197a   :  { %v2407_v41 = vmul.f32 %v3063_v31, %v2391_v32 }
0x197b   :  { %v3065_v36 = vpop.eup %3064 }
0x197c   :  { %v2413_v43 = vmul.f32 %v2638_v40, %v2407_v41  ;;  %v2408_v44 = vmul.f32 %v3065_v36, %v2392_v17 }
0x197e   :  { %v2414_v45 = vmul.f32 %v2638_v40, %v2408_v44  ;;  %v2419_v46 = vadd.f32 %v2639_v42, %v2413_v43 }
0x1980   :  { %v2420_v47 = vadd.f32 %v2639_v42, %v2414_v45  ;;  %v2421_v39 = vsel %vm170_vm6, %v2419_v46, 0.0 }
0x1981   :  { %v2422_v48 = vrot.slane %v2421_v39, 4 }
0x1982   :  { %v2428_v49 = vsel %vm170_vm6, %v2420_v47, 0.0 }
0x1983   :  { %v2423_v50 = vadd.f32 %v2422_v48, %v2421_v39  ;;  %v2429_v51 = vrot.slane %v2428_v49, 4 }
0x1985   :  { %v2424_v61 = vrot.slane %v2423_v50, 2  ;;  %v2430_v52 = vadd.f32 %v2429_v51, %v2428_v49 }
0x1987   :  { %v2425_v53 = vadd.f32 %v2424_v61, %v2423_v50  ;;  %v2431_v54 = vrot.slane %v2430_v52, 2 }
0x1989   :  { %v2426_v55 = vrot.slane %v2425_v53, 1  ;;  %v2432_v56 = vadd.f32 %v2431_v54, %v2430_v52 }
0x198b   :  { %v2427_v57 = vadd.f32 %v2426_v55, %v2425_v53  ;;  %v2433_v58 = vrot.slane %v2432_v56, 1 }
0x198d   :  { %v2434_v59 = vadd.f32 %v2433_v58, %v2432_v56  ;;  %v2435_v60 = vsub.f32 %v2427_v57, %v2419_v46 }
0x198f   :  { %v2436_v62 = vsub.f32 %v2434_v59, %v2420_v47  ;;  %v2437_v0 = vmul.f32 0.14285715, %v2435_v60 }
0x1991   :  { %v2438_v63 = vmul.f32 0.14285715, %v2436_v62 }
0x1993   :  { %v2450_v1 = vrot.slane %v2438_v63, 7 }
0x1995   :  { %v2452_v2 = vsel %vm2451_vm11, %v2450_v1, %v2437_v0 }
0x1996   :  { %2931 = vmatmul.mubr.msk.f32.vlgmr.msra.gmra.mrb[38].mxu1 %vm170_vm6, %v2452_v2 }
0x1a69   :  { %v2521_v14 = vpop.f32.mrb[38].mxu1 }
0x1a6a   :  { %v2522_v3 = vadd.f32 %v2640_v13, %v2521_v14  ;;  %v2932_v4 = vpop.f32.mrb[39].mxu1 }
0x1a6c   :  { %2525 = vst [vmem:[#allocation2] sm:$0x3] %v2522_v3 }
0x1a6d   :  { %3077 = shalt.err (!%p3074_p4)
}
0x1a6e   :  { %s3078_s0 = scalar_lea.hbm %s3614_s9, 32 }
0x1a6f   :  { %p3079_p5 = scmp.ne.s32.totalorder %s3614_s9, %s3078_s0  ;;  %p3082_p6 = scmp.lt.u32.totalorder %s3078_s0, %s3614_s9 }
0x1a71   :  { %p3084_p7 = pnand %p3082_p6, %p3079_p5 }
0x1a73   :  { %3087 = shalt.err (!%p3084_p7)
}
0x1a74   :  { %2535 = dma.vmem_to_hbm [thread:$0]  %s2533_s6, 32, %s3614_s9, [#allocation3]  }
0x1a75   :  { %3088 = dma.done.wait [#allocation3], 32  }
0x1a76   :  { %3089 = vsyncadd [#allocation3], 4294967264 }
0x1a77   :  { %2539 = vsyncpa [#allocation3], 1 }

</bundles_post_ra>
